<compile_context>
chip_gen: v7x
topology: tpu7x:2x2x1
jax: 0.10.0
libtpu: 0.0.40
codegen_flags: <defaults>
</compile_context>

<pallas_src>
import math

import jax
import jax.numpy as jnp
from jax.experimental import pallas as pl
from jax.experimental.pallas import tpu as pltpu

# ---------------- config (small, consistent with the forward) ----------------
VOCAB = 64
HIDDEN = 32
N_LAYERS = 2
N_HEADS = 2
HEAD_DIM = HIDDEN // N_HEADS
FFN = 64
MAX_POS = 16
BATCH = 2
SEQ = 8
LARGE_NEG = -1000000000.0
LN_EPS = 1e-12


# ------------------------------ fused kernel ---------------------------------
def _bert_fused_kernel(emb_ref, bias_ref, emb_g_ref, emb_b_ref,
                       wq_ref, bq_ref, wk_ref, bk_ref, wv_ref, bv_ref,
                       wo_ref, bo_ref, w1_ref, b1_ref, w2_ref, b2_ref,
                       ln1_g_ref, ln1_b_ref, ln2_g_ref, ln2_b_ref,
                       attw_ref, out_ref):
    """Entire BertSiameseClassifier forward for one (tiny) batch in VMEM.

    emb_ref  : (B*S, H)        summed word+pos+type embeddings (f32)
    bias_ref : (B, 1, S)       additive key mask bias = (1 - mask) * LARGE_NEG
    wq/wk/wv : (L, nH, H, Dh)  per-head projection weights (bf16)
    wo_ref   : (L, nH, Dh, H)  per-head output projection (bf16)
    out_ref  : (B, H)          pooled sentence representation (f32)
    """
    B, _, S = bias_ref.shape
    H = emb_ref.shape[1]
    nH = N_HEADS
    Dh = H // nH
    L = wq_ref.shape[0]
    scale = 1.0 / math.sqrt(Dh)

    def layer_norm(x, g, b):
        mu = jnp.mean(x, axis=-1, keepdims=True)
        var = jnp.mean(jnp.square(x - mu), axis=-1, keepdims=True)
        return (x - mu) * jax.lax.rsqrt(var + LN_EPS) * g + b

    def masked_softmax(logits, bias):
        # `bias` already has the same shape as `logits` (pre-broadcast, hoisted).
        logits = logits + bias
        logits = logits - jnp.max(logits, axis=-1, keepdims=True)
        p = jnp.exp(logits)
        denom = jnp.sum(p, axis=-1, keepdims=True)
        return p * pl.reciprocal(denom, approx=True)

    # ---- mask bias: load + broadcast once, reuse everywhere ------------------
    bias_rows = [bias_ref[b] for b in range(B)]                      # (1, S)
    bias_tiles = [jnp.broadcast_to(r, (S, S)) for r in bias_rows]    # (S, S)

    # ---- embedding LayerNorm --------------------------------------------------
    x = layer_norm(emb_ref[...], emb_g_ref[...], emb_b_ref[...])     # (B*S, H) f32

    # ---- transformer layers (post-LN BERT style), statically unrolled --------
    for l in range(L):
        x_bf = x.astype(jnp.bfloat16)
        attn_acc = [None] * B                                        # per-batch (S, H)

        for h in range(nH):
            wq_lh = wq_ref[l, h]                                     # (H, Dh) bf16
            wk_lh = wk_ref[l, h]
            wv_lh = wv_ref[l, h]
            wo_lh = wo_ref[l, h]                                     # (Dh, H) bf16
            # per-head projections across both batch rows at once; the head
            # split is done by the weight layout, no lane extraction needed.
            q_all = jnp.dot(x_bf, wq_lh,
                            preferred_element_type=jnp.float32) + bq_ref[l, h]
            k_all = jnp.dot(x_bf, wk_lh,
                            preferred_element_type=jnp.float32) + bk_ref[l, h]
            v_all = jnp.dot(x_bf, wv_lh,
                            preferred_element_type=jnp.float32) + bv_ref[l, h]

            for b in range(B):
                r0 = b * S                                           # multiple of 8
                qh = q_all[r0:r0 + S]                                # (S, Dh)
                kh = k_all[r0:r0 + S]
                vh = v_all[r0:r0 + S]
                s = jax.lax.dot_general(
                    qh, kh, (((1,), (1,)), ((), ())),
                    preferred_element_type=jnp.float32) * scale      # (S, S)
                p = masked_softmax(s, bias_tiles[b])                 # (S, S)
                ctx_h = jnp.dot(p, vh,
                                preferred_element_type=jnp.float32)  # (S, Dh)
                # fold the output projection into the head loop: stays in vregs.
                part = jnp.dot(ctx_h.astype(jnp.bfloat16), wo_lh,
                               preferred_element_type=jnp.float32)   # (S, H)
                attn_acc[b] = part if attn_acc[b] is None else attn_acc[b] + part

        attn_out = jnp.concatenate(attn_acc, axis=0) + bo_ref[l]     # (B*S, H)
        x = layer_norm(x + attn_out, ln1_g_ref[l], ln1_b_ref[l])

        ff = jnp.dot(x.astype(jnp.bfloat16), w1_ref[l],
                     preferred_element_type=jnp.float32) + b1_ref[l]
        # TODO(synk): HF BERT default gelu is the exact erf form; tanh approx
        # used here for a guaranteed EUP lowering (tiny numeric deviation).
        ff = jax.nn.gelu(ff, approximate=True)
        ff = jnp.dot(ff.astype(jnp.bfloat16), w2_ref[l],
                     preferred_element_type=jnp.float32) + b2_ref[l]
        x = layer_norm(x + ff, ln2_g_ref[l], ln2_b_ref[l])

    # ---- pooling head: tanh -> attention_fc -> masked softmax -> weighted sum
    hid = jnp.tanh(x)                                                # (B*S, H) f32
    w_att = attw_ref[...]                                            # (1, H) f32
    pooled_rows = []
    for b in range(B):
        hb = hid[b * S:(b + 1) * S, :]                               # (S, H)
        logits = jax.lax.dot_general(
            w_att, hb, (((1,), (1,)), ((), ())),
            preferred_element_type=jnp.float32)                      # (1, S)
        att = masked_softmax(logits, bias_rows[b])                   # (1, S)
        pooled_rows.append(jnp.dot(att, hb,
                                   preferred_element_type=jnp.float32))  # (1, H)
    # single (B, H) store instead of per-row masked stores
    out_ref[...] = jnp.concatenate(pooled_rows, axis=0)


def _full_spec(shape):
    """Whole-array BlockSpec for a grid=(1,) call."""
    return pl.BlockSpec(tuple(shape), lambda *_: (0,) * len(shape))


# ------------------------------ model wiring ---------------------------------
def init_params(key):
    def normal(k, shape, scale=0.02, dtype=jnp.float32):
        return (scale * jax.random.normal(k, shape, dtype=jnp.float32)).astype(dtype)

    L, H, F, nH, Dh = N_LAYERS, HIDDEN, FFN, N_HEADS, HEAD_DIM
    keys = jax.random.split(key, 10)
    params = {
        "word_emb": normal(keys[0], (VOCAB, H)),
        "pos_emb": normal(keys[1], (MAX_POS, H)),
        "type_emb": normal(keys[2], (2, H)),
        "emb_ln_g": jnp.ones((1, H), jnp.float32),
        "emb_ln_b": jnp.zeros((1, H), jnp.float32),
        # nn.Linear(hidden_size, 1, bias=False)
        "att_fc_w": normal(keys[3], (1, H)),
        # per-head projection weights (bf16 MXU operands, f32 accumulation)
        "wq": normal(keys[4], (L, nH, H, Dh), dtype=jnp.bfloat16),
        "wk": normal(keys[5], (L, nH, H, Dh), dtype=jnp.bfloat16),
        "wv": normal(keys[6], (L, nH, H, Dh), dtype=jnp.bfloat16),
        "bq": jnp.zeros((L, nH, 1, Dh), jnp.float32),
        "bk": jnp.zeros((L, nH, 1, Dh), jnp.float32),
        "bv": jnp.zeros((L, nH, 1, Dh), jnp.float32),
        "wo": normal(keys[7], (L, nH, Dh, H), dtype=jnp.bfloat16),
        "bo": jnp.zeros((L, 1, H), jnp.float32),
        "w1": normal(keys[8], (L, H, F), dtype=jnp.bfloat16),
        "b1": jnp.zeros((L, 1, F), jnp.float32),
        "w2": normal(keys[9], (L, F, H), dtype=jnp.bfloat16),
        "b2": jnp.zeros((L, 1, H), jnp.float32),
        "ln1_g": jnp.ones((L, 1, H), jnp.float32),
        "ln1_b": jnp.zeros((L, 1, H), jnp.float32),
        "ln2_g": jnp.ones((L, 1, H), jnp.float32),
        "ln2_b": jnp.zeros((L, 1, H), jnp.float32),
    }
    return params


def bert_siamese_forward(params, ids, mask):
    """Equivalent of BertSiameseClassifier.forward(input, mode='train')."""
    B, S = ids.shape
    H = HIDDEN
    mask = mask.astype(jnp.float32)
    # Additive key-mask bias, computed once and reused by every layer + pool.
    att_bias = ((1.0 - mask) * LARGE_NEG).reshape(B, 1, S)

    # Embedding gather (token/position/type) is XLA glue; everything after it
    # runs inside one fused Pallas kernel.
    emb = (params["word_emb"][ids]
           + params["pos_emb"][:S][None, :, :]
           + params["type_emb"][0][None, None, :]).reshape(B * S, H)

    operands = (
        emb, att_bias,
        params["emb_ln_g"], params["emb_ln_b"],
        params["wq"], params["bq"],
        params["wk"], params["bk"],
        params["wv"], params["bv"],
        params["wo"], params["bo"],
        params["w1"], params["b1"],
        params["w2"], params["b2"],
        params["ln1_g"], params["ln1_b"],
        params["ln2_g"], params["ln2_b"],
        params["att_fc_w"],
    )

    return pl.pallas_call(
        _bert_fused_kernel,
        out_shape=jax.ShapeDtypeStruct((B, H), jnp.float32),
        grid=(1,),
        in_specs=[_full_spec(op.shape) for op in operands],
        out_specs=_full_spec((B, H)),
        compiler_params=pltpu.CompilerParams(
            dimension_semantics=("arbitrary",)),
    )(*operands)


# TODO(synk): gradient checkpointing and CrossEntropyLoss are training-only /
# unused in this forward path and are not translated.

if __name__ == "__main__":
    key = jax.random.PRNGKey(0)
    pkey, ikey = jax.random.split(key)
    params = init_params(pkey)

    ids = jax.random.randint(ikey, (BATCH, SEQ), 0, VOCAB, dtype=jnp.int32)
    mask = jnp.array([[1.0] * SEQ,
                      [1.0] * 5 + [0.0] * 3], dtype=jnp.float32)

    out = jax.jit(bert_siamese_forward)(params, ids, mask)
    out = jax.block_until_ready(out)

    assert out.shape == (BATCH, HIDDEN), out.shape
    assert bool(jnp.all(jnp.isfinite(out)))
    print("KERNEL_OK")
</pallas_src>

<mosaic_0001>
module attributes {stable_mosaic.version = 11 : i64} {
  func.func @_bert_fused_kernel(%arg0: i32, %arg1: memref<16x32xf32, #tpu.memory_space<vmem>>, %arg2: memref<2x1x8xf32, #tpu.memory_space<vmem>>, %arg3: memref<1x32xf32, #tpu.memory_space<vmem>>, %arg4: memref<1x32xf32, #tpu.memory_space<vmem>>, %arg5: memref<2x2x32x16xbf16, #tpu.memory_space<vmem>>, %arg6: memref<2x2x1x16xf32, #tpu.memory_space<vmem>>, %arg7: memref<2x2x32x16xbf16, #tpu.memory_space<vmem>>, %arg8: memref<2x2x1x16xf32, #tpu.memory_space<vmem>>, %arg9: memref<2x2x32x16xbf16, #tpu.memory_space<vmem>>, %arg10: memref<2x2x1x16xf32, #tpu.memory_space<vmem>>, %arg11: memref<2x2x16x32xbf16, #tpu.memory_space<vmem>>, %arg12: memref<2x1x32xf32, #tpu.memory_space<vmem>>, %arg13: memref<2x32x64xbf16, #tpu.memory_space<vmem>>, %arg14: memref<2x1x64xf32, #tpu.memory_space<vmem>>, %arg15: memref<2x64x32xbf16, #tpu.memory_space<vmem>>, %arg16: memref<2x1x32xf32, #tpu.memory_space<vmem>>, %arg17: memref<2x1x32xf32, #tpu.memory_space<vmem>>, %arg18: memref<2x1x32xf32, #tpu.memory_space<vmem>>, %arg19: memref<2x1x32xf32, #tpu.memory_space<vmem>>, %arg20: memref<2x1x32xf32, #tpu.memory_space<vmem>>, %arg21: memref<1x32xf32, #tpu.memory_space<vmem>>, %arg22: memref<2x32xf32, #tpu.memory_space<vmem>>) attributes {dimension_semantics = [#tpu.dimension_semantics<arbitrary>], iteration_bounds = array<i64: 1>, scalar_prefetch = 0 : i64, scratch_operands = 0 : i64, tpu.core_type = #tpu.core_type<tc>, window_params = [{pipeline_mode = #tpu.pipeline_mode<synchronous>, transform_indices = @transform_0, window_bounds = array<i64: 16, 32>}, {pipeline_mode = #tpu.pipeline_mode<synchronous>, transform_indices = @transform_1, window_bounds = array<i64: 2, 1, 8>}, {pipeline_mode = #tpu.pipeline_mode<synchronous>, transform_indices = @transform_2, window_bounds = array<i64: 1, 32>}, {pipeline_mode = #tpu.pipeline_mode<synchronous>, transform_indices = @transform_3, window_bounds = array<i64: 1, 32>}, {pipeline_mode = #tpu.pipeline_mode<synchronous>, transform_indices = @transform_4, window_bounds = array<i64: 2, 2, 32, 16>}, {pipeline_mode = #tpu.pipeline_mode<synchronous>, transform_indices = @transform_5, window_bounds = array<i64: 2, 2, 1, 16>}, {pipeline_mode = #tpu.pipeline_mode<synchronous>, transform_indices = @transform_6, window_bounds = array<i64: 2, 2, 32, 16>}, {pipeline_mode = #tpu.pipeline_mode<synchronous>, transform_indices = @transform_7, window_bounds = array<i64: 2, 2, 1, 16>}, {pipeline_mode = #tpu.pipeline_mode<synchronous>, transform_indices = @transform_8, window_bounds = array<i64: 2, 2, 32, 16>}, {pipeline_mode = #tpu.pipeline_mode<synchronous>, transform_indices = @transform_9, window_bounds = array<i64: 2, 2, 1, 16>}, {pipeline_mode = #tpu.pipeline_mode<synchronous>, transform_indices = @transform_10, window_bounds = array<i64: 2, 2, 16, 32>}, {pipeline_mode = #tpu.pipeline_mode<synchronous>, transform_indices = @transform_11, window_bounds = array<i64: 2, 1, 32>}, {pipeline_mode = #tpu.pipeline_mode<synchronous>, transform_indices = @transform_12, window_bounds = array<i64: 2, 32, 64>}, {pipeline_mode = #tpu.pipeline_mode<synchronous>, transform_indices = @transform_13, window_bounds = array<i64: 2, 1, 64>}, {pipeline_mode = #tpu.pipeline_mode<synchronous>, transform_indices = @transform_14, window_bounds = array<i64: 2, 64, 32>}, {pipeline_mode = #tpu.pipeline_mode<synchronous>, transform_indices = @transform_15, window_bounds = array<i64: 2, 1, 32>}, {pipeline_mode = #tpu.pipeline_mode<synchronous>, transform_indices = @transform_16, window_bounds = array<i64: 2, 1, 32>}, {pipeline_mode = #tpu.pipeline_mode<synchronous>, transform_indices = @transform_17, window_bounds = array<i64: 2, 1, 32>}, {pipeline_mode = #tpu.pipeline_mode<synchronous>, transform_indices = @transform_18, window_bounds = array<i64: 2, 1, 32>}, {pipeline_mode = #tpu.pipeline_mode<synchronous>, transform_indices = @transform_19, window_bounds = array<i64: 2, 1, 32>}, {pipeline_mode = #tpu.pipeline_mode<synchronous>, transform_indices = @transform_20, window_bounds = array<i64: 1, 32>}, {pipeline_mode = #tpu.pipeline_mode<synchronous>, transform_indices = @transform_21, window_bounds = array<i64: 2, 32>}]} {
    %c0 = arith.constant 0 : index
    %c0_0 = arith.constant 0 : index
    %c0_1 = arith.constant 0 : index
    %0 = vector.load %arg2[%c0, %c0_0, %c0_1] : memref<2x1x8xf32, #tpu.memory_space<vmem>>, vector<1x1x8xf32>
    %1 = vector.shape_cast %0 : vector<1x1x8xf32> to vector<1x8xf32>
    %c1 = arith.constant 1 : index
    %c0_2 = arith.constant 0 : index
    %c0_3 = arith.constant 0 : index
    %2 = vector.load %arg2[%c1, %c0_2, %c0_3] : memref<2x1x8xf32, #tpu.memory_space<vmem>>, vector<1x1x8xf32>
    %3 = vector.shape_cast %2 : vector<1x1x8xf32> to vector<1x8xf32>
    %4 = vector.shape_cast %1 : vector<1x8xf32> to vector<1x8xf32>
    %5 = vector.broadcast %4 : vector<1x8xf32> to vector<8x8xf32>
    %6 = vector.shape_cast %3 : vector<1x8xf32> to vector<1x8xf32>
    %7 = vector.broadcast %6 : vector<1x8xf32> to vector<8x8xf32>
    %c0_4 = arith.constant 0 : index
    %c0_5 = arith.constant 0 : index
    %8 = vector.load %arg1[%c0_4, %c0_5] : memref<16x32xf32, #tpu.memory_space<vmem>>, vector<16x32xf32>
    %c0_6 = arith.constant 0 : index
    %c0_7 = arith.constant 0 : index
    %9 = vector.load %arg3[%c0_6, %c0_7] : memref<1x32xf32, #tpu.memory_space<vmem>>, vector<1x32xf32>
    %c0_8 = arith.constant 0 : index
    %c0_9 = arith.constant 0 : index
    %10 = vector.load %arg4[%c0_8, %c0_9] : memref<1x32xf32, #tpu.memory_space<vmem>>, vector<1x32xf32>
    %cst = arith.constant dense<0.000000e+00> : vector<16xf32>
    %11 = vector.multi_reduction <add>, %8, %cst [1] : vector<16x32xf32> to vector<16xf32>
    %12 = vector.shape_cast %11 : vector<16xf32> to vector<16x1xf32>
    %cst_10 = arith.constant 3.200000e+01 : f32
    %13 = vector.broadcast %cst_10 : f32 to vector<16x1xf32>
    %14 = arith.divf %12, %13 : vector<16x1xf32>
    %15 = vector.broadcast %14 : vector<16x1xf32> to vector<16x32xf32>
    %16 = arith.subf %8, %15 : vector<16x32xf32>
    %17 = arith.mulf %16, %16 : vector<16x32xf32>
    %cst_11 = arith.constant dense<0.000000e+00> : vector<16xf32>
    %18 = vector.multi_reduction <add>, %17, %cst_11 [1] : vector<16x32xf32> to vector<16xf32>
    %19 = vector.shape_cast %18 : vector<16xf32> to vector<16x1xf32>
    %cst_12 = arith.constant 3.200000e+01 : f32
    %20 = vector.broadcast %cst_12 : f32 to vector<16x1xf32>
    %21 = arith.divf %19, %20 : vector<16x1xf32>
    %22 = vector.broadcast %14 : vector<16x1xf32> to vector<16x32xf32>
    %23 = arith.subf %8, %22 : vector<16x32xf32>
    %cst_13 = arith.constant 9.99999996E-13 : f32
    %24 = vector.broadcast %cst_13 : f32 to vector<16x1xf32>
    %25 = arith.addf %21, %24 : vector<16x1xf32>
    %26 = math.rsqrt %25 : vector<16x1xf32>
    %27 = vector.broadcast %26 : vector<16x1xf32> to vector<16x32xf32>
    %28 = arith.mulf %23, %27 : vector<16x32xf32>
    %29 = vector.broadcast %9 : vector<1x32xf32> to vector<16x32xf32>
    %30 = arith.mulf %28, %29 : vector<16x32xf32>
    %31 = vector.broadcast %10 : vector<1x32xf32> to vector<16x32xf32>
    %32 = arith.addf %30, %31 : vector<16x32xf32>
    %33 = arith.truncf %32 : vector<16x32xf32> to vector<16x32xbf16>
    %c0_14 = arith.constant 0 : index
    %c0_15 = arith.constant 0 : index
    %c0_16 = arith.constant 0 : index
    %c0_17 = arith.constant 0 : index
    %34 = vector.load %arg5[%c0_14, %c0_15, %c0_16, %c0_17] : memref<2x2x32x16xbf16, #tpu.memory_space<vmem>>, vector<1x1x32x16xbf16>
    %35 = vector.shape_cast %34 : vector<1x1x32x16xbf16> to vector<32x16xbf16>
    %c0_18 = arith.constant 0 : index
    %c0_19 = arith.constant 0 : index
    %c0_20 = arith.constant 0 : index
    %c0_21 = arith.constant 0 : index
    %36 = vector.load %arg7[%c0_18, %c0_19, %c0_20, %c0_21] : memref<2x2x32x16xbf16, #tpu.memory_space<vmem>>, vector<1x1x32x16xbf16>
    %37 = vector.shape_cast %36 : vector<1x1x32x16xbf16> to vector<32x16xbf16>
    %c0_22 = arith.constant 0 : index
    %c0_23 = arith.constant 0 : index
    %c0_24 = arith.constant 0 : index
    %c0_25 = arith.constant 0 : index
    %38 = vector.load %arg9[%c0_22, %c0_23, %c0_24, %c0_25] : memref<2x2x32x16xbf16, #tpu.memory_space<vmem>>, vector<1x1x32x16xbf16>
    %39 = vector.shape_cast %38 : vector<1x1x32x16xbf16> to vector<32x16xbf16>
    %c0_26 = arith.constant 0 : index
    %c0_27 = arith.constant 0 : index
    %c0_28 = arith.constant 0 : index
    %c0_29 = arith.constant 0 : index
    %40 = vector.load %arg11[%c0_26, %c0_27, %c0_28, %c0_29] : memref<2x2x16x32xbf16, #tpu.memory_space<vmem>>, vector<1x1x16x32xbf16>
    %41 = vector.shape_cast %40 : vector<1x1x16x32xbf16> to vector<16x32xbf16>
    %cst_30 = arith.constant dense<0.000000e+00> : vector<16x16xf32>
    %42 = tpu.matmul %33, %35, %cst_30 {dimension_numbers = #tpu.dot_dimension_numbers<[1], [0], [0], [1], [0, 0, 1, 1], [], []>} : vector<16x32xbf16>, vector<32x16xbf16>, vector<16x16xf32> -> vector<16x16xf32>
    %c0_31 = arith.constant 0 : index
    %c0_32 = arith.constant 0 : index
    %c0_33 = arith.constant 0 : index
    %c0_34 = arith.constant 0 : index
    %43 = vector.load %arg6[%c0_31, %c0_32, %c0_33, %c0_34] : memref<2x2x1x16xf32, #tpu.memory_space<vmem>>, vector<1x1x1x16xf32>
    %44 = vector.shape_cast %43 : vector<1x1x1x16xf32> to vector<1x16xf32>
    %45 = vector.broadcast %44 : vector<1x16xf32> to vector<16x16xf32>
    %46 = arith.addf %42, %45 : vector<16x16xf32>
    %cst_35 = arith.constant dense<0.000000e+00> : vector<16x16xf32>
    %47 = tpu.matmul %33, %37, %cst_35 {dimension_numbers = #tpu.dot_dimension_numbers<[1], [0], [0], [1], [0, 0, 1, 1], [], []>} : vector<16x32xbf16>, vector<32x16xbf16>, vector<16x16xf32> -> vector<16x16xf32>
    %c0_36 = arith.constant 0 : index
    %c0_37 = arith.constant 0 : index
    %c0_38 = arith.constant 0 : index
    %c0_39 = arith.constant 0 : index
    %48 = vector.load %arg8[%c0_36, %c0_37, %c0_38, %c0_39] : memref<2x2x1x16xf32, #tpu.memory_space<vmem>>, vector<1x1x1x16xf32>
    %49 = vector.shape_cast %48 : vector<1x1x1x16xf32> to vector<1x16xf32>
    %50 = vector.broadcast %49 : vector<1x16xf32> to vector<16x16xf32>
    %51 = arith.addf %47, %50 : vector<16x16xf32>
    %cst_40 = arith.constant dense<0.000000e+00> : vector<16x16xf32>
    %52 = tpu.matmul %33, %39, %cst_40 {dimension_numbers = #tpu.dot_dimension_numbers<[1], [0], [0], [1], [0, 0, 1, 1], [], []>} : vector<16x32xbf16>, vector<32x16xbf16>, vector<16x16xf32> -> vector<16x16xf32>
    %c0_41 = arith.constant 0 : index
    %c0_42 = arith.constant 0 : index
    %c0_43 = arith.constant 0 : index
    %c0_44 = arith.constant 0 : index
    %53 = vector.load %arg10[%c0_41, %c0_42, %c0_43, %c0_44] : memref<2x2x1x16xf32, #tpu.memory_space<vmem>>, vector<1x1x1x16xf32>
    %54 = vector.shape_cast %53 : vector<1x1x1x16xf32> to vector<1x16xf32>
    %55 = vector.broadcast %54 : vector<1x16xf32> to vector<16x16xf32>
    %56 = arith.addf %52, %55 : vector<16x16xf32>
    %57 = vector.extract_strided_slice %46 {offsets = [0, 0], sizes = [8, 16], strides = [1, 1]} : vector<16x16xf32> to vector<8x16xf32>
    %58 = vector.extract_strided_slice %51 {offsets = [0, 0], sizes = [8, 16], strides = [1, 1]} : vector<16x16xf32> to vector<8x16xf32>
    %59 = vector.extract_strided_slice %56 {offsets = [0, 0], sizes = [8, 16], strides = [1, 1]} : vector<16x16xf32> to vector<8x16xf32>
    %cst_45 = arith.constant dense<0.000000e+00> : vector<8x8xf32>
    %60 = tpu.matmul %57, %58, %cst_45 {dimension_numbers = #tpu.dot_dimension_numbers<[1], [1], [0], [0], [0, 0, 1, 0], [], []>} : vector<8x16xf32>, vector<8x16xf32>, vector<8x8xf32> -> vector<8x8xf32>
    %cst_46 = arith.constant 2.500000e-01 : f32
    %61 = vector.broadcast %cst_46 : f32 to vector<8x8xf32>
    %62 = arith.mulf %60, %61 : vector<8x8xf32>
    %63 = arith.addf %62, %5 : vector<8x8xf32>
    %cst_47 = arith.constant dense<0xFF800000> : vector<8xf32>
    %64 = vector.multi_reduction <maximumf>, %63, %cst_47 [1] : vector<8x8xf32> to vector<8xf32>
    %65 = vector.shape_cast %64 : vector<8xf32> to vector<8x1xf32>
    %66 = vector.broadcast %65 : vector<8x1xf32> to vector<8x8xf32>
    %67 = arith.subf %63, %66 : vector<8x8xf32>
    %68 = math.exp %67 : vector<8x8xf32>
    %cst_48 = arith.constant dense<0.000000e+00> : vector<8xf32>
    %69 = vector.multi_reduction <add>, %68, %cst_48 [1] : vector<8x8xf32> to vector<8xf32>
    %70 = vector.shape_cast %69 : vector<8xf32> to vector<8x1xf32>
    %71 = tpu.reciprocal %70 {approx = true} : vector<8x1xf32> -> vector<8x1xf32>
    %72 = vector.broadcast %71 : vector<8x1xf32> to vector<8x8xf32>
    %73 = arith.mulf %68, %72 : vector<8x8xf32>
    %cst_49 = arith.constant dense<0.000000e+00> : vector<8x16xf32>
    %74 = tpu.matmul %73, %59, %cst_49 {dimension_numbers = #tpu.dot_dimension_numbers<[1], [0], [0], [1], [0, 0, 1, 1], [], []>} : vector<8x8xf32>, vector<8x16xf32>, vector<8x16xf32> -> vector<8x16xf32>
    %75 = arith.truncf %74 : vector<8x16xf32> to vector<8x16xbf16>
    %cst_50 = arith.constant dense<0.000000e+00> : vector<8x32xf32>
    %76 = tpu.matmul %75, %41, %cst_50 {dimension_numbers = #tpu.dot_dimension_numbers<[1], [0], [0], [1], [0, 0, 1, 1], [], []>} : vector<8x16xbf16>, vector<16x32xbf16>, vector<8x32xf32> -> vector<8x32xf32>
    %77 = vector.extract_strided_slice %46 {offsets = [8, 0], sizes = [8, 16], strides = [1, 1]} : vector<16x16xf32> to vector<8x16xf32>
    %78 = vector.extract_strided_slice %51 {offsets = [8, 0], sizes = [8, 16], strides = [1, 1]} : vector<16x16xf32> to vector<8x16xf32>
    %79 = vector.extract_strided_slice %56 {offsets = [8, 0], sizes = [8, 16], strides = [1, 1]} : vector<16x16xf32> to vector<8x16xf32>
    %cst_51 = arith.constant dense<0.000000e+00> : vector<8x8xf32>
    %80 = tpu.matmul %77, %78, %cst_51 {dimension_numbers = #tpu.dot_dimension_numbers<[1], [1], [0], [0], [0, 0, 1, 0], [], []>} : vector<8x16xf32>, vector<8x16xf32>, vector<8x8xf32> -> vector<8x8xf32>
    %cst_52 = arith.constant 2.500000e-01 : f32
    %81 = vector.broadcast %cst_52 : f32 to vector<8x8xf32>
    %82 = arith.mulf %80, %81 : vector<8x8xf32>
    %83 = arith.addf %82, %7 : vector<8x8xf32>
    %cst_53 = arith.constant dense<0xFF800000> : vector<8xf32>
    %84 = vector.multi_reduction <maximumf>, %83, %cst_53 [1] : vector<8x8xf32> to vector<8xf32>
    %85 = vector.shape_cast %84 : vector<8xf32> to vector<8x1xf32>
    %86 = vector.broadcast %85 : vector<8x1xf32> to vector<8x8xf32>
    %87 = arith.subf %83, %86 : vector<8x8xf32>
    %88 = math.exp %87 : vector<8x8xf32>
    %cst_54 = arith.constant dense<0.000000e+00> : vector<8xf32>
    %89 = vector.multi_reduction <add>, %88, %cst_54 [1] : vector<8x8xf32> to vector<8xf32>
    %90 = vector.shape_cast %89 : vector<8xf32> to vector<8x1xf32>
    %91 = tpu.reciprocal %90 {approx = true} : vector<8x1xf32> -> vector<8x1xf32>
    %92 = vector.broadcast %91 : vector<8x1xf32> to vector<8x8xf32>
    %93 = arith.mulf %88, %92 : vector<8x8xf32>
    %cst_55 = arith.constant dense<0.000000e+00> : vector<8x16xf32>
    %94 = tpu.matmul %93, %79, %cst_55 {dimension_numbers = #tpu.dot_dimension_numbers<[1], [0], [0], [1], [0, 0, 1, 1], [], []>} : vector<8x8xf32>, vector<8x16xf32>, vector<8x16xf32> -> vector<8x16xf32>
    %95 = arith.truncf %94 : vector<8x16xf32> to vector<8x16xbf16>
    %cst_56 = arith.constant dense<0.000000e+00> : vector<8x32xf32>
    %96 = tpu.matmul %95, %41, %cst_56 {dimension_numbers = #tpu.dot_dimension_numbers<[1], [0], [0], [1], [0, 0, 1, 1], [], []>} : vector<8x16xbf16>, vector<16x32xbf16>, vector<8x32xf32> -> vector<8x32xf32>
    %c0_57 = arith.constant 0 : index
    %c1_58 = arith.constant 1 : index
    %c0_59 = arith.constant 0 : index
    %c0_60 = arith.constant 0 : index
    %97 = vector.load %arg5[%c0_57, %c1_58, %c0_59, %c0_60] : memref<2x2x32x16xbf16, #tpu.memory_space<vmem>>, vector<1x1x32x16xbf16>
    %98 = vector.shape_cast %97 : vector<1x1x32x16xbf16> to vector<32x16xbf16>
    %c0_61 = arith.constant 0 : index
    %c1_62 = arith.constant 1 : index
    %c0_63 = arith.constant 0 : index
    %c0_64 = arith.constant 0 : index
    %99 = vector.load %arg7[%c0_61, %c1_62, %c0_63, %c0_64] : memref<2x2x32x16xbf16, #tpu.memory_space<vmem>>, vector<1x1x32x16xbf16>
    %100 = vector.shape_cast %99 : vector<1x1x32x16xbf16> to vector<32x16xbf16>
    %c0_65 = arith.constant 0 : index
    %c1_66 = arith.constant 1 : index
    %c0_67 = arith.constant 0 : index
    %c0_68 = arith.constant 0 : index
    %101 = vector.load %arg9[%c0_65, %c1_66, %c0_67, %c0_68] : memref<2x2x32x16xbf16, #tpu.memory_space<vmem>>, vector<1x1x32x16xbf16>
    %102 = vector.shape_cast %101 : vector<1x1x32x16xbf16> to vector<32x16xbf16>
    %c0_69 = arith.constant 0 : index
    %c1_70 = arith.constant 1 : index
    %c0_71 = arith.constant 0 : index
    %c0_72 = arith.constant 0 : index
    %103 = vector.load %arg11[%c0_69, %c1_70, %c0_71, %c0_72] : memref<2x2x16x32xbf16, #tpu.memory_space<vmem>>, vector<1x1x16x32xbf16>
    %104 = vector.shape_cast %103 : vector<1x1x16x32xbf16> to vector<16x32xbf16>
    %cst_73 = arith.constant dense<0.000000e+00> : vector<16x16xf32>
    %105 = tpu.matmul %33, %98, %cst_73 {dimension_numbers = #tpu.dot_dimension_numbers<[1], [0], [0], [1], [0, 0, 1, 1], [], []>} : vector<16x32xbf16>, vector<32x16xbf16>, vector<16x16xf32> -> vector<16x16xf32>
    %c0_74 = arith.constant 0 : index
    %c1_75 = arith.constant 1 : index
    %c0_76 = arith.constant 0 : index
    %c0_77 = arith.constant 0 : index
    %106 = vector.load %arg6[%c0_74, %c1_75, %c0_76, %c0_77] : memref<2x2x1x16xf32, #tpu.memory_space<vmem>>, vector<1x1x1x16xf32>
    %107 = vector.shape_cast %106 : vector<1x1x1x16xf32> to vector<1x16xf32>
    %108 = vector.broadcast %107 : vector<1x16xf32> to vector<16x16xf32>
    %109 = arith.addf %105, %108 : vector<16x16xf32>
    %cst_78 = arith.constant dense<0.000000e+00> : vector<16x16xf32>
    %110 = tpu.matmul %33, %100, %cst_78 {dimension_numbers = #tpu.dot_dimension_numbers<[1], [0], [0], [1], [0, 0, 1, 1], [], []>} : vector<16x32xbf16>, vector<32x16xbf16>, vector<16x16xf32> -> vector<16x16xf32>
    %c0_79 = arith.constant 0 : index
    %c1_80 = arith.constant 1 : index
    %c0_81 = arith.constant 0 : index
    %c0_82 = arith.constant 0 : index
    %111 = vector.load %arg8[%c0_79, %c1_80, %c0_81, %c0_82] : memref<2x2x1x16xf32, #tpu.memory_space<vmem>>, vector<1x1x1x16xf32>
    %112 = vector.shape_cast %111 : vector<1x1x1x16xf32> to vector<1x16xf32>
    %113 = vector.broadcast %112 : vector<1x16xf32> to vector<16x16xf32>
    %114 = arith.addf %110, %113 : vector<16x16xf32>
    %cst_83 = arith.constant dense<0.000000e+00> : vector<16x16xf32>
    %115 = tpu.matmul %33, %102, %cst_83 {dimension_numbers = #tpu.dot_dimension_numbers<[1], [0], [0], [1], [0, 0, 1, 1], [], []>} : vector<16x32xbf16>, vector<32x16xbf16>, vector<16x16xf32> -> vector<16x16xf32>
    %c0_84 = arith.constant 0 : index
    %c1_85 = arith.constant 1 : index
    %c0_86 = arith.constant 0 : index
    %c0_87 = arith.constant 0 : index
    %116 = vector.load %arg10[%c0_84, %c1_85, %c0_86, %c0_87] : memref<2x2x1x16xf32, #tpu.memory_space<vmem>>, vector<1x1x1x16xf32>
    %117 = vector.shape_cast %116 : vector<1x1x1x16xf32> to vector<1x16xf32>
    %118 = vector.broadcast %117 : vector<1x16xf32> to vector<16x16xf32>
    %119 = arith.addf %115, %118 : vector<16x16xf32>
    %120 = vector.extract_strided_slice %109 {offsets = [0, 0], sizes = [8, 16], strides = [1, 1]} : vector<16x16xf32> to vector<8x16xf32>
    %121 = vector.extract_strided_slice %114 {offsets = [0, 0], sizes = [8, 16], strides = [1, 1]} : vector<16x16xf32> to vector<8x16xf32>
    %122 = vector.extract_strided_slice %119 {offsets = [0, 0], sizes = [8, 16], strides = [1, 1]} : vector<16x16xf32> to vector<8x16xf32>
    %cst_88 = arith.constant dense<0.000000e+00> : vector<8x8xf32>
    %123 = tpu.matmul %120, %121, %cst_88 {dimension_numbers = #tpu.dot_dimension_numbers<[1], [1], [0], [0], [0, 0, 1, 0], [], []>} : vector<8x16xf32>, vector<8x16xf32>, vector<8x8xf32> -> vector<8x8xf32>
    %cst_89 = arith.constant 2.500000e-01 : f32
    %124 = vector.broadcast %cst_89 : f32 to vector<8x8xf32>
    %125 = arith.mulf %123, %124 : vector<8x8xf32>
    %126 = arith.addf %125, %5 : vector<8x8xf32>
    %cst_90 = arith.constant dense<0xFF800000> : vector<8xf32>
    %127 = vector.multi_reduction <maximumf>, %126, %cst_90 [1] : vector<8x8xf32> to vector<8xf32>
    %128 = vector.shape_cast %127 : vector<8xf32> to vector<8x1xf32>
    %129 = vector.broadcast %128 : vector<8x1xf32> to vector<8x8xf32>
    %130 = arith.subf %126, %129 : vector<8x8xf32>
    %131 = math.exp %130 : vector<8x8xf32>
    %cst_91 = arith.constant dense<0.000000e+00> : vector<8xf32>
    %132 = vector.multi_reduction <add>, %131, %cst_91 [1] : vector<8x8xf32> to vector<8xf32>
    %133 = vector.shape_cast %132 : vector<8xf32> to vector<8x1xf32>
    %134 = tpu.reciprocal %133 {approx = true} : vector<8x1xf32> -> vector<8x1xf32>
    %135 = vector.broadcast %134 : vector<8x1xf32> to vector<8x8xf32>
    %136 = arith.mulf %131, %135 : vector<8x8xf32>
    %cst_92 = arith.constant dense<0.000000e+00> : vector<8x16xf32>
    %137 = tpu.matmul %136, %122, %cst_92 {dimension_numbers = #tpu.dot_dimension_numbers<[1], [0], [0], [1], [0, 0, 1, 1], [], []>} : vector<8x8xf32>, vector<8x16xf32>, vector<8x16xf32> -> vector<8x16xf32>
    %138 = arith.truncf %137 : vector<8x16xf32> to vector<8x16xbf16>
    %cst_93 = arith.constant dense<0.000000e+00> : vector<8x32xf32>
    %139 = tpu.matmul %138, %104, %cst_93 {dimension_numbers = #tpu.dot_dimension_numbers<[1], [0], [0], [1], [0, 0, 1, 1], [], []>} : vector<8x16xbf16>, vector<16x32xbf16>, vector<8x32xf32> -> vector<8x32xf32>
    %140 = arith.addf %76, %139 : vector<8x32xf32>
    %141 = vector.extract_strided_slice %109 {offsets = [8, 0], sizes = [8, 16], strides = [1, 1]} : vector<16x16xf32> to vector<8x16xf32>
    %142 = vector.extract_strided_slice %114 {offsets = [8, 0], sizes = [8, 16], strides = [1, 1]} : vector<16x16xf32> to vector<8x16xf32>
    %143 = vector.extract_strided_slice %119 {offsets = [8, 0], sizes = [8, 16], strides = [1, 1]} : vector<16x16xf32> to vector<8x16xf32>
    %cst_94 = arith.constant dense<0.000000e+00> : vector<8x8xf32>
    %144 = tpu.matmul %141, %142, %cst_94 {dimension_numbers = #tpu.dot_dimension_numbers<[1], [1], [0], [0], [0, 0, 1, 0], [], []>} : vector<8x16xf32>, vector<8x16xf32>, vector<8x8xf32> -> vector<8x8xf32>
    %cst_95 = arith.constant 2.500000e-01 : f32
    %145 = vector.broadcast %cst_95 : f32 to vector<8x8xf32>
    %146 = arith.mulf %144, %145 : vector<8x8xf32>
    %147 = arith.addf %146, %7 : vector<8x8xf32>
    %cst_96 = arith.constant dense<0xFF800000> : vector<8xf32>
    %148 = vector.multi_reduction <maximumf>, %147, %cst_96 [1] : vector<8x8xf32> to vector<8xf32>
    %149 = vector.shape_cast %148 : vector<8xf32> to vector<8x1xf32>
    %150 = vector.broadcast %149 : vector<8x1xf32> to vector<8x8xf32>
    %151 = arith.subf %147, %150 : vector<8x8xf32>
    %152 = math.exp %151 : vector<8x8xf32>
    %cst_97 = arith.constant dense<0.000000e+00> : vector<8xf32>
    %153 = vector.multi_reduction <add>, %152, %cst_97 [1] : vector<8x8xf32> to vector<8xf32>
    %154 = vector.shape_cast %153 : vector<8xf32> to vector<8x1xf32>
    %155 = tpu.reciprocal %154 {approx = true} : vector<8x1xf32> -> vector<8x1xf32>
    %156 = vector.broadcast %155 : vector<8x1xf32> to vector<8x8xf32>
    %157 = arith.mulf %152, %156 : vector<8x8xf32>
    %cst_98 = arith.constant dense<0.000000e+00> : vector<8x16xf32>
    %158 = tpu.matmul %157, %143, %cst_98 {dimension_numbers = #tpu.dot_dimension_numbers<[1], [0], [0], [1], [0, 0, 1, 1], [], []>} : vector<8x8xf32>, vector<8x16xf32>, vector<8x16xf32> -> vector<8x16xf32>
    %159 = arith.truncf %158 : vector<8x16xf32> to vector<8x16xbf16>
    %cst_99 = arith.constant dense<0.000000e+00> : vector<8x32xf32>
    %160 = tpu.matmul %159, %104, %cst_99 {dimension_numbers = #tpu.dot_dimension_numbers<[1], [0], [0], [1], [0, 0, 1, 1], [], []>} : vector<8x16xbf16>, vector<16x32xbf16>, vector<8x32xf32> -> vector<8x32xf32>
    %161 = arith.addf %96, %160 : vector<8x32xf32>
    %162 = tpu.concatenate %140, %161 in 0 : vector<8x32xf32>, vector<8x32xf32> -> vector<16x32xf32>
    %c0_100 = arith.constant 0 : index
    %c0_101 = arith.constant 0 : index
    %c0_102 = arith.constant 0 : index
    %163 = vector.load %arg12[%c0_100, %c0_101, %c0_102] : memref<2x1x32xf32, #tpu.memory_space<vmem>>, vector<1x1x32xf32>
    %164 = vector.shape_cast %163 : vector<1x1x32xf32> to vector<1x32xf32>
    %165 = vector.broadcast %164 : vector<1x32xf32> to vector<16x32xf32>
    %166 = arith.addf %162, %165 : vector<16x32xf32>
    %167 = arith.addf %32, %166 : vector<16x32xf32>
    %c0_103 = arith.constant 0 : index
    %c0_104 = arith.constant 0 : index
    %c0_105 = arith.constant 0 : index
    %168 = vector.load %arg17[%c0_103, %c0_104, %c0_105] : memref<2x1x32xf32, #tpu.memory_space<vmem>>, vector<1x1x32xf32>
    %169 = vector.shape_cast %168 : vector<1x1x32xf32> to vector<1x32xf32>
    %c0_106 = arith.constant 0 : index
    %c0_107 = arith.constant 0 : index
    %c0_108 = arith.constant 0 : index
    %170 = vector.load %arg18[%c0_106, %c0_107, %c0_108] : memref<2x1x32xf32, #tpu.memory_space<vmem>>, vector<1x1x32xf32>
    %171 = vector.shape_cast %170 : vector<1x1x32xf32> to vector<1x32xf32>
    %cst_109 = arith.constant dense<0.000000e+00> : vector<16xf32>
    %172 = vector.multi_reduction <add>, %167, %cst_109 [1] : vector<16x32xf32> to vector<16xf32>
    %173 = vector.shape_cast %172 : vector<16xf32> to vector<16x1xf32>
    %cst_110 = arith.constant 3.200000e+01 : f32
    %174 = vector.broadcast %cst_110 : f32 to vector<16x1xf32>
    %175 = arith.divf %173, %174 : vector<16x1xf32>
    %176 = vector.broadcast %175 : vector<16x1xf32> to vector<16x32xf32>
    %177 = arith.subf %167, %176 : vector<16x32xf32>
    %178 = arith.mulf %177, %177 : vector<16x32xf32>
    %cst_111 = arith.constant dense<0.000000e+00> : vector<16xf32>
    %179 = vector.multi_reduction <add>, %178, %cst_111 [1] : vector<16x32xf32> to vector<16xf32>
    %180 = vector.shape_cast %179 : vector<16xf32> to vector<16x1xf32>
    %cst_112 = arith.constant 3.200000e+01 : f32
    %181 = vector.broadcast %cst_112 : f32 to vector<16x1xf32>
    %182 = arith.divf %180, %181 : vector<16x1xf32>
    %183 = vector.broadcast %175 : vector<16x1xf32> to vector<16x32xf32>
    %184 = arith.subf %167, %183 : vector<16x32xf32>
    %cst_113 = arith.constant 9.99999996E-13 : f32
    %185 = vector.broadcast %cst_113 : f32 to vector<16x1xf32>
    %186 = arith.addf %182, %185 : vector<16x1xf32>
    %187 = math.rsqrt %186 : vector<16x1xf32>
    %188 = vector.broadcast %187 : vector<16x1xf32> to vector<16x32xf32>
    %189 = arith.mulf %184, %188 : vector<16x32xf32>
    %190 = vector.broadcast %169 : vector<1x32xf32> to vector<16x32xf32>
    %191 = arith.mulf %189, %190 : vector<16x32xf32>
    %192 = vector.broadcast %171 : vector<1x32xf32> to vector<16x32xf32>
    %193 = arith.addf %191, %192 : vector<16x32xf32>
    %194 = arith.truncf %193 : vector<16x32xf32> to vector<16x32xbf16>
    %c0_114 = arith.constant 0 : index
    %c0_115 = arith.constant 0 : index
    %c0_116 = arith.constant 0 : index
    %195 = vector.load %arg13[%c0_114, %c0_115, %c0_116] : memref<2x32x64xbf16, #tpu.memory_space<vmem>>, vector<1x32x64xbf16>
    %196 = vector.shape_cast %195 : vector<1x32x64xbf16> to vector<32x64xbf16>
    %cst_117 = arith.constant dense<0.000000e+00> : vector<16x64xf32>
    %197 = tpu.matmul %194, %196, %cst_117 {dimension_numbers = #tpu.dot_dimension_numbers<[1], [0], [0], [1], [0, 0, 1, 1], [], []>} : vector<16x32xbf16>, vector<32x64xbf16>, vector<16x64xf32> -> vector<16x64xf32>
    %c0_118 = arith.constant 0 : index
    %c0_119 = arith.constant 0 : index
    %c0_120 = arith.constant 0 : index
    %198 = vector.load %arg14[%c0_118, %c0_119, %c0_120] : memref<2x1x64xf32, #tpu.memory_space<vmem>>, vector<1x1x64xf32>
    %199 = vector.shape_cast %198 : vector<1x1x64xf32> to vector<1x64xf32>
    %200 = vector.broadcast %199 : vector<1x64xf32> to vector<16x64xf32>
    %201 = arith.addf %197, %200 : vector<16x64xf32>
    %202 = arith.mulf %201, %201 : vector<16x64xf32>
    %203 = arith.mulf %201, %202 : vector<16x64xf32>
    %cst_121 = arith.constant 4.471500e-02 : f32
    %204 = vector.broadcast %cst_121 : f32 to vector<16x64xf32>
    %205 = arith.mulf %204, %203 : vector<16x64xf32>
    %206 = arith.addf %201, %205 : vector<16x64xf32>
    %cst_122 = arith.constant 0.797884583 : f32
    %207 = vector.broadcast %cst_122 : f32 to vector<16x64xf32>
    %208 = arith.mulf %207, %206 : vector<16x64xf32>
    %209 = math.tanh %208 : vector<16x64xf32>
    %cst_123 = arith.constant 1.000000e+00 : f32
    %210 = vector.broadcast %cst_123 : f32 to vector<16x64xf32>
    %211 = arith.addf %210, %209 : vector<16x64xf32>
    %cst_124 = arith.constant 5.000000e-01 : f32
    %212 = vector.broadcast %cst_124 : f32 to vector<16x64xf32>
    %213 = arith.mulf %212, %211 : vector<16x64xf32>
    %214 = arith.mulf %201, %213 : vector<16x64xf32>
    %215 = arith.truncf %214 : vector<16x64xf32> to vector<16x64xbf16>
    %c0_125 = arith.constant 0 : index
    %c0_126 = arith.constant 0 : index
    %c0_127 = arith.constant 0 : index
    %216 = vector.load %arg15[%c0_125, %c0_126, %c0_127] : memref<2x64x32xbf16, #tpu.memory_space<vmem>>, vector<1x64x32xbf16>
    %217 = vector.shape_cast %216 : vector<1x64x32xbf16> to vector<64x32xbf16>
    %cst_128 = arith.constant dense<0.000000e+00> : vector<16x32xf32>
    %218 = tpu.matmul %215, %217, %cst_128 {dimension_numbers = #tpu.dot_dimension_numbers<[1], [0], [0], [1], [0, 0, 1, 1], [], []>} : vector<16x64xbf16>, vector<64x32xbf16>, vector<16x32xf32> -> vector<16x32xf32>
    %c0_129 = arith.constant 0 : index
    %c0_130 = arith.constant 0 : index
    %c0_131 = arith.constant 0 : index
    %219 = vector.load %arg16[%c0_129, %c0_130, %c0_131] : memref<2x1x32xf32, #tpu.memory_space<vmem>>, vector<1x1x32xf32>
    %220 = vector.shape_cast %219 : vector<1x1x32xf32> to vector<1x32xf32>
    %221 = vector.broadcast %220 : vector<1x32xf32> to vector<16x32xf32>
    %222 = arith.addf %218, %221 : vector<16x32xf32>
    %223 = arith.addf %193, %222 : vector<16x32xf32>
    %c0_132 = arith.constant 0 : index
    %c0_133 = arith.constant 0 : index
    %c0_134 = arith.constant 0 : index
    %224 = vector.load %arg19[%c0_132, %c0_133, %c0_134] : memref<2x1x32xf32, #tpu.memory_space<vmem>>, vector<1x1x32xf32>
    %225 = vector.shape_cast %224 : vector<1x1x32xf32> to vector<1x32xf32>
    %c0_135 = arith.constant 0 : index
    %c0_136 = arith.constant 0 : index
    %c0_137 = arith.constant 0 : index
    %226 = vector.load %arg20[%c0_135, %c0_136, %c0_137] : memref<2x1x32xf32, #tpu.memory_space<vmem>>, vector<1x1x32xf32>
    %227 = vector.shape_cast %226 : vector<1x1x32xf32> to vector<1x32xf32>
    %cst_138 = arith.constant dense<0.000000e+00> : vector<16xf32>
    %228 = vector.multi_reduction <add>, %223, %cst_138 [1] : vector<16x32xf32> to vector<16xf32>
    %229 = vector.shape_cast %228 : vector<16xf32> to vector<16x1xf32>
    %cst_139 = arith.constant 3.200000e+01 : f32
    %230 = vector.broadcast %cst_139 : f32 to vector<16x1xf32>
    %231 = arith.divf %229, %230 : vector<16x1xf32>
    %232 = vector.broadcast %231 : vector<16x1xf32> to vector<16x32xf32>
    %233 = arith.subf %223, %232 : vector<16x32xf32>
    %234 = arith.mulf %233, %233 : vector<16x32xf32>
    %cst_140 = arith.constant dense<0.000000e+00> : vector<16xf32>
    %235 = vector.multi_reduction <add>, %234, %cst_140 [1] : vector<16x32xf32> to vector<16xf32>
    %236 = vector.shape_cast %235 : vector<16xf32> to vector<16x1xf32>
    %cst_141 = arith.constant 3.200000e+01 : f32
    %237 = vector.broadcast %cst_141 : f32 to vector<16x1xf32>
    %238 = arith.divf %236, %237 : vector<16x1xf32>
    %239 = vector.broadcast %231 : vector<16x1xf32> to vector<16x32xf32>
    %240 = arith.subf %223, %239 : vector<16x32xf32>
    %cst_142 = arith.constant 9.99999996E-13 : f32
    %241 = vector.broadcast %cst_142 : f32 to vector<16x1xf32>
    %242 = arith.addf %238, %241 : vector<16x1xf32>
    %243 = math.rsqrt %242 : vector<16x1xf32>
    %244 = vector.broadcast %243 : vector<16x1xf32> to vector<16x32xf32>
    %245 = arith.mulf %240, %244 : vector<16x32xf32>
    %246 = vector.broadcast %225 : vector<1x32xf32> to vector<16x32xf32>
    %247 = arith.mulf %245, %246 : vector<16x32xf32>
    %248 = vector.broadcast %227 : vector<1x32xf32> to vector<16x32xf32>
    %249 = arith.addf %247, %248 : vector<16x32xf32>
    %250 = arith.truncf %249 : vector<16x32xf32> to vector<16x32xbf16>
    %c1_143 = arith.constant 1 : index
    %c0_144 = arith.constant 0 : index
    %c0_145 = arith.constant 0 : index
    %c0_146 = arith.constant 0 : index
    %251 = vector.load %arg5[%c1_143, %c0_144, %c0_145, %c0_146] : memref<2x2x32x16xbf16, #tpu.memory_space<vmem>>, vector<1x1x32x16xbf16>
    %252 = vector.shape_cast %251 : vector<1x1x32x16xbf16> to vector<32x16xbf16>
    %c1_147 = arith.constant 1 : index
    %c0_148 = arith.constant 0 : index
    %c0_149 = arith.constant 0 : index
    %c0_150 = arith.constant 0 : index
    %253 = vector.load %arg7[%c1_147, %c0_148, %c0_149, %c0_150] : memref<2x2x32x16xbf16, #tpu.memory_space<vmem>>, vector<1x1x32x16xbf16>
    %254 = vector.shape_cast %253 : vector<1x1x32x16xbf16> to vector<32x16xbf16>
    %c1_151 = arith.constant 1 : index
    %c0_152 = arith.constant 0 : index
    %c0_153 = arith.constant 0 : index
    %c0_154 = arith.constant 0 : index
    %255 = vector.load %arg9[%c1_151, %c0_152, %c0_153, %c0_154] : memref<2x2x32x16xbf16, #tpu.memory_space<vmem>>, vector<1x1x32x16xbf16>
    %256 = vector.shape_cast %255 : vector<1x1x32x16xbf16> to vector<32x16xbf16>
    %c1_155 = arith.constant 1 : index
    %c0_156 = arith.constant 0 : index
    %c0_157 = arith.constant 0 : index
    %c0_158 = arith.constant 0 : index
    %257 = vector.load %arg11[%c1_155, %c0_156, %c0_157, %c0_158] : memref<2x2x16x32xbf16, #tpu.memory_space<vmem>>, vector<1x1x16x32xbf16>
    %258 = vector.shape_cast %257 : vector<1x1x16x32xbf16> to vector<16x32xbf16>
    %cst_159 = arith.constant dense<0.000000e+00> : vector<16x16xf32>
    %259 = tpu.matmul %250, %252, %cst_159 {dimension_numbers = #tpu.dot_dimension_numbers<[1], [0], [0], [1], [0, 0, 1, 1], [], []>} : vector<16x32xbf16>, vector<32x16xbf16>, vector<16x16xf32> -> vector<16x16xf32>
    %c1_160 = arith.constant 1 : index
    %c0_161 = arith.constant 0 : index
    %c0_162 = arith.constant 0 : index
    %c0_163 = arith.constant 0 : index
    %260 = vector.load %arg6[%c1_160, %c0_161, %c0_162, %c0_163] : memref<2x2x1x16xf32, #tpu.memory_space<vmem>>, vector<1x1x1x16xf32>
    %261 = vector.shape_cast %260 : vector<1x1x1x16xf32> to vector<1x16xf32>
    %262 = vector.broadcast %261 : vector<1x16xf32> to vector<16x16xf32>
    %263 = arith.addf %259, %262 : vector<16x16xf32>
    %cst_164 = arith.constant dense<0.000000e+00> : vector<16x16xf32>
    %264 = tpu.matmul %250, %254, %cst_164 {dimension_numbers = #tpu.dot_dimension_numbers<[1], [0], [0], [1], [0, 0, 1, 1], [], []>} : vector<16x32xbf16>, vector<32x16xbf16>, vector<16x16xf32> -> vector<16x16xf32>
    %c1_165 = arith.constant 1 : index
    %c0_166 = arith.constant 0 : index
    %c0_167 = arith.constant 0 : index
    %c0_168 = arith.constant 0 : index
    %265 = vector.load %arg8[%c1_165, %c0_166, %c0_167, %c0_168] : memref<2x2x1x16xf32, #tpu.memory_space<vmem>>, vector<1x1x1x16xf32>
    %266 = vector.shape_cast %265 : vector<1x1x1x16xf32> to vector<1x16xf32>
    %267 = vector.broadcast %266 : vector<1x16xf32> to vector<16x16xf32>
    %268 = arith.addf %264, %267 : vector<16x16xf32>
    %cst_169 = arith.constant dense<0.000000e+00> : vector<16x16xf32>
    %269 = tpu.matmul %250, %256, %cst_169 {dimension_numbers = #tpu.dot_dimension_numbers<[1], [0], [0], [1], [0, 0, 1, 1], [], []>} : vector<16x32xbf16>, vector<32x16xbf16>, vector<16x16xf32> -> vector<16x16xf32>
    %c1_170 = arith.constant 1 : index
    %c0_171 = arith.constant 0 : index
    %c0_172 = arith.constant 0 : index
    %c0_173 = arith.constant 0 : index
    %270 = vector.load %arg10[%c1_170, %c0_171, %c0_172, %c0_173] : memref<2x2x1x16xf32, #tpu.memory_space<vmem>>, vector<1x1x1x16xf32>
    %271 = vector.shape_cast %270 : vector<1x1x1x16xf32> to vector<1x16xf32>
    %272 = vector.broadcast %271 : vector<1x16xf32> to vector<16x16xf32>
    %273 = arith.addf %269, %272 : vector<16x16xf32>
    %274 = vector.extract_strided_slice %263 {offsets = [0, 0], sizes = [8, 16], strides = [1, 1]} : vector<16x16xf32> to vector<8x16xf32>
    %275 = vector.extract_strided_slice %268 {offsets = [0, 0], sizes = [8, 16], strides = [1, 1]} : vector<16x16xf32> to vector<8x16xf32>
    %276 = vector.extract_strided_slice %273 {offsets = [0, 0], sizes = [8, 16], strides = [1, 1]} : vector<16x16xf32> to vector<8x16xf32>
    %cst_174 = arith.constant dense<0.000000e+00> : vector<8x8xf32>
    %277 = tpu.matmul %274, %275, %cst_174 {dimension_numbers = #tpu.dot_dimension_numbers<[1], [1], [0], [0], [0, 0, 1, 0], [], []>} : vector<8x16xf32>, vector<8x16xf32>, vector<8x8xf32> -> vector<8x8xf32>
    %cst_175 = arith.constant 2.500000e-01 : f32
    %278 = vector.broadcast %cst_175 : f32 to vector<8x8xf32>
    %279 = arith.mulf %277, %278 : vector<8x8xf32>
    %280 = arith.addf %279, %5 : vector<8x8xf32>
    %cst_176 = arith.constant dense<0xFF800000> : vector<8xf32>
    %281 = vector.multi_reduction <maximumf>, %280, %cst_176 [1] : vector<8x8xf32> to vector<8xf32>
    %282 = vector.shape_cast %281 : vector<8xf32> to vector<8x1xf32>
    %283 = vector.broadcast %282 : vector<8x1xf32> to vector<8x8xf32>
    %284 = arith.subf %280, %283 : vector<8x8xf32>
    %285 = math.exp %284 : vector<8x8xf32>
    %cst_177 = arith.constant dense<0.000000e+00> : vector<8xf32>
    %286 = vector.multi_reduction <add>, %285, %cst_177 [1] : vector<8x8xf32> to vector<8xf32>
    %287 = vector.shape_cast %286 : vector<8xf32> to vector<8x1xf32>
    %288 = tpu.reciprocal %287 {approx = true} : vector<8x1xf32> -> vector<8x1xf32>
    %289 = vector.broadcast %288 : vector<8x1xf32> to vector<8x8xf32>
    %290 = arith.mulf %285, %289 : vector<8x8xf32>
    %cst_178 = arith.constant dense<0.000000e+00> : vector<8x16xf32>
    %291 = tpu.matmul %290, %276, %cst_178 {dimension_numbers = #tpu.dot_dimension_numbers<[1], [0], [0], [1], [0, 0, 1, 1], [], []>} : vector<8x8xf32>, vector<8x16xf32>, vector<8x16xf32> -> vector<8x16xf32>
    %292 = arith.truncf %291 : vector<8x16xf32> to vector<8x16xbf16>
    %cst_179 = arith.constant dense<0.000000e+00> : vector<8x32xf32>
    %293 = tpu.matmul %292, %258, %cst_179 {dimension_numbers = #tpu.dot_dimension_numbers<[1], [0], [0], [1], [0, 0, 1, 1], [], []>} : vector<8x16xbf16>, vector<16x32xbf16>, vector<8x32xf32> -> vector<8x32xf32>
    %294 = vector.extract_strided_slice %263 {offsets = [8, 0], sizes = [8, 16], strides = [1, 1]} : vector<16x16xf32> to vector<8x16xf32>
    %295 = vector.extract_strided_slice %268 {offsets = [8, 0], sizes = [8, 16], strides = [1, 1]} : vector<16x16xf32> to vector<8x16xf32>
    %296 = vector.extract_strided_slice %273 {offsets = [8, 0], sizes = [8, 16], strides = [1, 1]} : vector<16x16xf32> to vector<8x16xf32>
    %cst_180 = arith.constant dense<0.000000e+00> : vector<8x8xf32>
    %297 = tpu.matmul %294, %295, %cst_180 {dimension_numbers = #tpu.dot_dimension_numbers<[1], [1], [0], [0], [0, 0, 1, 0], [], []>} : vector<8x16xf32>, vector<8x16xf32>, vector<8x8xf32> -> vector<8x8xf32>
    %cst_181 = arith.constant 2.500000e-01 : f32
    %298 = vector.broadcast %cst_181 : f32 to vector<8x8xf32>
    %299 = arith.mulf %297, %298 : vector<8x8xf32>
    %300 = arith.addf %299, %7 : vector<8x8xf32>
    %cst_182 = arith.constant dense<0xFF800000> : vector<8xf32>
    %301 = vector.multi_reduction <maximumf>, %300, %cst_182 [1] : vector<8x8xf32> to vector<8xf32>
    %302 = vector.shape_cast %301 : vector<8xf32> to vector<8x1xf32>
    %303 = vector.broadcast %302 : vector<8x1xf32> to vector<8x8xf32>
    %304 = arith.subf %300, %303 : vector<8x8xf32>
    %305 = math.exp %304 : vector<8x8xf32>
    %cst_183 = arith.constant dense<0.000000e+00> : vector<8xf32>
    %306 = vector.multi_reduction <add>, %305, %cst_183 [1] : vector<8x8xf32> to vector<8xf32>
    %307 = vector.shape_cast %306 : vector<8xf32> to vector<8x1xf32>
    %308 = tpu.reciprocal %307 {approx = true} : vector<8x1xf32> -> vector<8x1xf32>
    %309 = vector.broadcast %308 : vector<8x1xf32> to vector<8x8xf32>
    %310 = arith.mulf %305, %309 : vector<8x8xf32>
    %cst_184 = arith.constant dense<0.000000e+00> : vector<8x16xf32>
    %311 = tpu.matmul %310, %296, %cst_184 {dimension_numbers = #tpu.dot_dimension_numbers<[1], [0], [0], [1], [0, 0, 1, 1], [], []>} : vector<8x8xf32>, vector<8x16xf32>, vector<8x16xf32> -> vector<8x16xf32>
    %312 = arith.truncf %311 : vector<8x16xf32> to vector<8x16xbf16>
    %cst_185 = arith.constant dense<0.000000e+00> : vector<8x32xf32>
    %313 = tpu.matmul %312, %258, %cst_185 {dimension_numbers = #tpu.dot_dimension_numbers<[1], [0], [0], [1], [0, 0, 1, 1], [], []>} : vector<8x16xbf16>, vector<16x32xbf16>, vector<8x32xf32> -> vector<8x32xf32>
    %c1_186 = arith.constant 1 : index
    %c1_187 = arith.constant 1 : index
    %c0_188 = arith.constant 0 : index
    %c0_189 = arith.constant 0 : index
    %314 = vector.load %arg5[%c1_186, %c1_187, %c0_188, %c0_189] : memref<2x2x32x16xbf16, #tpu.memory_space<vmem>>, vector<1x1x32x16xbf16>
    %315 = vector.shape_cast %314 : vector<1x1x32x16xbf16> to vector<32x16xbf16>
    %c1_190 = arith.constant 1 : index
    %c1_191 = arith.constant 1 : index
    %c0_192 = arith.constant 0 : index
    %c0_193 = arith.constant 0 : index
    %316 = vector.load %arg7[%c1_190, %c1_191, %c0_192, %c0_193] : memref<2x2x32x16xbf16, #tpu.memory_space<vmem>>, vector<1x1x32x16xbf16>
    %317 = vector.shape_cast %316 : vector<1x1x32x16xbf16> to vector<32x16xbf16>
    %c1_194 = arith.constant 1 : index
    %c1_195 = arith.constant 1 : index
    %c0_196 = arith.constant 0 : index
    %c0_197 = arith.constant 0 : index
    %318 = vector.load %arg9[%c1_194, %c1_195, %c0_196, %c0_197] : memref<2x2x32x16xbf16, #tpu.memory_space<vmem>>, vector<1x1x32x16xbf16>
    %319 = vector.shape_cast %318 : vector<1x1x32x16xbf16> to vector<32x16xbf16>
    %c1_198 = arith.constant 1 : index
    %c1_199 = arith.constant 1 : index
    %c0_200 = arith.constant 0 : index
    %c0_201 = arith.constant 0 : index
    %320 = vector.load %arg11[%c1_198, %c1_199, %c0_200, %c0_201] : memref<2x2x16x32xbf16, #tpu.memory_space<vmem>>, vector<1x1x16x32xbf16>
    %321 = vector.shape_cast %320 : vector<1x1x16x32xbf16> to vector<16x32xbf16>
    %cst_202 = arith.constant dense<0.000000e+00> : vector<16x16xf32>
    %322 = tpu.matmul %250, %315, %cst_202 {dimension_numbers = #tpu.dot_dimension_numbers<[1], [0], [0], [1], [0, 0, 1, 1], [], []>} : vector<16x32xbf16>, vector<32x16xbf16>, vector<16x16xf32> -> vector<16x16xf32>
    %c1_203 = arith.constant 1 : index
    %c1_204 = arith.constant 1 : index
    %c0_205 = arith.constant 0 : index
    %c0_206 = arith.constant 0 : index
    %323 = vector.load %arg6[%c1_203, %c1_204, %c0_205, %c0_206] : memref<2x2x1x16xf32, #tpu.memory_space<vmem>>, vector<1x1x1x16xf32>
    %324 = vector.shape_cast %323 : vector<1x1x1x16xf32> to vector<1x16xf32>
    %325 = vector.broadcast %324 : vector<1x16xf32> to vector<16x16xf32>
    %326 = arith.addf %322, %325 : vector<16x16xf32>
    %cst_207 = arith.constant dense<0.000000e+00> : vector<16x16xf32>
    %327 = tpu.matmul %250, %317, %cst_207 {dimension_numbers = #tpu.dot_dimension_numbers<[1], [0], [0], [1], [0, 0, 1, 1], [], []>} : vector<16x32xbf16>, vector<32x16xbf16>, vector<16x16xf32> -> vector<16x16xf32>
    %c1_208 = arith.constant 1 : index
    %c1_209 = arith.constant 1 : index
    %c0_210 = arith.constant 0 : index
    %c0_211 = arith.constant 0 : index
    %328 = vector.load %arg8[%c1_208, %c1_209, %c0_210, %c0_211] : memref<2x2x1x16xf32, #tpu.memory_space<vmem>>, vector<1x1x1x16xf32>
    %329 = vector.shape_cast %328 : vector<1x1x1x16xf32> to vector<1x16xf32>
    %330 = vector.broadcast %329 : vector<1x16xf32> to vector<16x16xf32>
    %331 = arith.addf %327, %330 : vector<16x16xf32>
    %cst_212 = arith.constant dense<0.000000e+00> : vector<16x16xf32>
    %332 = tpu.matmul %250, %319, %cst_212 {dimension_numbers = #tpu.dot_dimension_numbers<[1], [0], [0], [1], [0, 0, 1, 1], [], []>} : vector<16x32xbf16>, vector<32x16xbf16>, vector<16x16xf32> -> vector<16x16xf32>
    %c1_213 = arith.constant 1 : index
    %c1_214 = arith.constant 1 : index
    %c0_215 = arith.constant 0 : index
    %c0_216 = arith.constant 0 : index
    %333 = vector.load %arg10[%c1_213, %c1_214, %c0_215, %c0_216] : memref<2x2x1x16xf32, #tpu.memory_space<vmem>>, vector<1x1x1x16xf32>
    %334 = vector.shape_cast %333 : vector<1x1x1x16xf32> to vector<1x16xf32>
    %335 = vector.broadcast %334 : vector<1x16xf32> to vector<16x16xf32>
    %336 = arith.addf %332, %335 : vector<16x16xf32>
    %337 = vector.extract_strided_slice %326 {offsets = [0, 0], sizes = [8, 16], strides = [1, 1]} : vector<16x16xf32> to vector<8x16xf32>
    %338 = vector.extract_strided_slice %331 {offsets = [0, 0], sizes = [8, 16], strides = [1, 1]} : vector<16x16xf32> to vector<8x16xf32>
    %339 = vector.extract_strided_slice %336 {offsets = [0, 0], sizes = [8, 16], strides = [1, 1]} : vector<16x16xf32> to vector<8x16xf32>
    %cst_217 = arith.constant dense<0.000000e+00> : vector<8x8xf32>
    %340 = tpu.matmul %337, %338, %cst_217 {dimension_numbers = #tpu.dot_dimension_numbers<[1], [1], [0], [0], [0, 0, 1, 0], [], []>} : vector<8x16xf32>, vector<8x16xf32>, vector<8x8xf32> -> vector<8x8xf32>
    %cst_218 = arith.constant 2.500000e-01 : f32
    %341 = vector.broadcast %cst_218 : f32 to vector<8x8xf32>
    %342 = arith.mulf %340, %341 : vector<8x8xf32>
    %343 = arith.addf %342, %5 : vector<8x8xf32>
    %cst_219 = arith.constant dense<0xFF800000> : vector<8xf32>
    %344 = vector.multi_reduction <maximumf>, %343, %cst_219 [1] : vector<8x8xf32> to vector<8xf32>
    %345 = vector.shape_cast %344 : vector<8xf32> to vector<8x1xf32>
    %346 = vector.broadcast %345 : vector<8x1xf32> to vector<8x8xf32>
    %347 = arith.subf %343, %346 : vector<8x8xf32>
    %348 = math.exp %347 : vector<8x8xf32>
    %cst_220 = arith.constant dense<0.000000e+00> : vector<8xf32>
    %349 = vector.multi_reduction <add>, %348, %cst_220 [1] : vector<8x8xf32> to vector<8xf32>
    %350 = vector.shape_cast %349 : vector<8xf32> to vector<8x1xf32>
    %351 = tpu.reciprocal %350 {approx = true} : vector<8x1xf32> -> vector<8x1xf32>
    %352 = vector.broadcast %351 : vector<8x1xf32> to vector<8x8xf32>
    %353 = arith.mulf %348, %352 : vector<8x8xf32>
    %cst_221 = arith.constant dense<0.000000e+00> : vector<8x16xf32>
    %354 = tpu.matmul %353, %339, %cst_221 {dimension_numbers = #tpu.dot_dimension_numbers<[1], [0], [0], [1], [0, 0, 1, 1], [], []>} : vector<8x8xf32>, vector<8x16xf32>, vector<8x16xf32> -> vector<8x16xf32>
    %355 = arith.truncf %354 : vector<8x16xf32> to vector<8x16xbf16>
    %cst_222 = arith.constant dense<0.000000e+00> : vector<8x32xf32>
    %356 = tpu.matmul %355, %321, %cst_222 {dimension_numbers = #tpu.dot_dimension_numbers<[1], [0], [0], [1], [0, 0, 1, 1], [], []>} : vector<8x16xbf16>, vector<16x32xbf16>, vector<8x32xf32> -> vector<8x32xf32>
    %357 = arith.addf %293, %356 : vector<8x32xf32>
    %358 = vector.extract_strided_slice %326 {offsets = [8, 0], sizes = [8, 16], strides = [1, 1]} : vector<16x16xf32> to vector<8x16xf32>
    %359 = vector.extract_strided_slice %331 {offsets = [8, 0], sizes = [8, 16], strides = [1, 1]} : vector<16x16xf32> to vector<8x16xf32>
    %360 = vector.extract_strided_slice %336 {offsets = [8, 0], sizes = [8, 16], strides = [1, 1]} : vector<16x16xf32> to vector<8x16xf32>
    %cst_223 = arith.constant dense<0.000000e+00> : vector<8x8xf32>
    %361 = tpu.matmul %358, %359, %cst_223 {dimension_numbers = #tpu.dot_dimension_numbers<[1], [1], [0], [0], [0, 0, 1, 0], [], []>} : vector<8x16xf32>, vector<8x16xf32>, vector<8x8xf32> -> vector<8x8xf32>
    %cst_224 = arith.constant 2.500000e-01 : f32
    %362 = vector.broadcast %cst_224 : f32 to vector<8x8xf32>
    %363 = arith.mulf %361, %362 : vector<8x8xf32>
    %364 = arith.addf %363, %7 : vector<8x8xf32>
    %cst_225 = arith.constant dense<0xFF800000> : vector<8xf32>
    %365 = vector.multi_reduction <maximumf>, %364, %cst_225 [1] : vector<8x8xf32> to vector<8xf32>
    %366 = vector.shape_cast %365 : vector<8xf32> to vector<8x1xf32>
    %367 = vector.broadcast %366 : vector<8x1xf32> to vector<8x8xf32>
    %368 = arith.subf %364, %367 : vector<8x8xf32>
    %369 = math.exp %368 : vector<8x8xf32>
    %cst_226 = arith.constant dense<0.000000e+00> : vector<8xf32>
    %370 = vector.multi_reduction <add>, %369, %cst_226 [1] : vector<8x8xf32> to vector<8xf32>
    %371 = vector.shape_cast %370 : vector<8xf32> to vector<8x1xf32>
    %372 = tpu.reciprocal %371 {approx = true} : vector<8x1xf32> -> vector<8x1xf32>
    %373 = vector.broadcast %372 : vector<8x1xf32> to vector<8x8xf32>
    %374 = arith.mulf %369, %373 : vector<8x8xf32>
    %cst_227 = arith.constant dense<0.000000e+00> : vector<8x16xf32>
    %375 = tpu.matmul %374, %360, %cst_227 {dimension_numbers = #tpu.dot_dimension_numbers<[1], [0], [0], [1], [0, 0, 1, 1], [], []>} : vector<8x8xf32>, vector<8x16xf32>, vector<8x16xf32> -> vector<8x16xf32>
    %376 = arith.truncf %375 : vector<8x16xf32> to vector<8x16xbf16>
    %cst_228 = arith.constant dense<0.000000e+00> : vector<8x32xf32>
    %377 = tpu.matmul %376, %321, %cst_228 {dimension_numbers = #tpu.dot_dimension_numbers<[1], [0], [0], [1], [0, 0, 1, 1], [], []>} : vector<8x16xbf16>, vector<16x32xbf16>, vector<8x32xf32> -> vector<8x32xf32>
    %378 = arith.addf %313, %377 : vector<8x32xf32>
    %379 = tpu.concatenate %357, %378 in 0 : vector<8x32xf32>, vector<8x32xf32> -> vector<16x32xf32>
    %c1_229 = arith.constant 1 : index
    %c0_230 = arith.constant 0 : index
    %c0_231 = arith.constant 0 : index
    %380 = vector.load %arg12[%c1_229, %c0_230, %c0_231] : memref<2x1x32xf32, #tpu.memory_space<vmem>>, vector<1x1x32xf32>
    %381 = vector.shape_cast %380 : vector<1x1x32xf32> to vector<1x32xf32>
    %382 = vector.broadcast %381 : vector<1x32xf32> to vector<16x32xf32>
    %383 = arith.addf %379, %382 : vector<16x32xf32>
    %384 = arith.addf %249, %383 : vector<16x32xf32>
    %c1_232 = arith.constant 1 : index
    %c0_233 = arith.constant 0 : index
    %c0_234 = arith.constant 0 : index
    %385 = vector.load %arg17[%c1_232, %c0_233, %c0_234] : memref<2x1x32xf32, #tpu.memory_space<vmem>>, vector<1x1x32xf32>
    %386 = vector.shape_cast %385 : vector<1x1x32xf32> to vector<1x32xf32>
    %c1_235 = arith.constant 1 : index
    %c0_236 = arith.constant 0 : index
    %c0_237 = arith.constant 0 : index
    %387 = vector.load %arg18[%c1_235, %c0_236, %c0_237] : memref<2x1x32xf32, #tpu.memory_space<vmem>>, vector<1x1x32xf32>
    %388 = vector.shape_cast %387 : vector<1x1x32xf32> to vector<1x32xf32>
    %cst_238 = arith.constant dense<0.000000e+00> : vector<16xf32>
    %389 = vector.multi_reduction <add>, %384, %cst_238 [1] : vector<16x32xf32> to vector<16xf32>
    %390 = vector.shape_cast %389 : vector<16xf32> to vector<16x1xf32>
    %cst_239 = arith.constant 3.200000e+01 : f32
    %391 = vector.broadcast %cst_239 : f32 to vector<16x1xf32>
    %392 = arith.divf %390, %391 : vector<16x1xf32>
    %393 = vector.broadcast %392 : vector<16x1xf32> to vector<16x32xf32>
    %394 = arith.subf %384, %393 : vector<16x32xf32>
    %395 = arith.mulf %394, %394 : vector<16x32xf32>
    %cst_240 = arith.constant dense<0.000000e+00> : vector<16xf32>
    %396 = vector.multi_reduction <add>, %395, %cst_240 [1] : vector<16x32xf32> to vector<16xf32>
    %397 = vector.shape_cast %396 : vector<16xf32> to vector<16x1xf32>
    %cst_241 = arith.constant 3.200000e+01 : f32
    %398 = vector.broadcast %cst_241 : f32 to vector<16x1xf32>
    %399 = arith.divf %397, %398 : vector<16x1xf32>
    %400 = vector.broadcast %392 : vector<16x1xf32> to vector<16x32xf32>
    %401 = arith.subf %384, %400 : vector<16x32xf32>
    %cst_242 = arith.constant 9.99999996E-13 : f32
    %402 = vector.broadcast %cst_242 : f32 to vector<16x1xf32>
    %403 = arith.addf %399, %402 : vector<16x1xf32>
    %404 = math.rsqrt %403 : vector<16x1xf32>
    %405 = vector.broadcast %404 : vector<16x1xf32> to vector<16x32xf32>
    %406 = arith.mulf %401, %405 : vector<16x32xf32>
    %407 = vector.broadcast %386 : vector<1x32xf32> to vector<16x32xf32>
    %408 = arith.mulf %406, %407 : vector<16x32xf32>
    %409 = vector.broadcast %388 : vector<1x32xf32> to vector<16x32xf32>
    %410 = arith.addf %408, %409 : vector<16x32xf32>
    %411 = arith.truncf %410 : vector<16x32xf32> to vector<16x32xbf16>
    %c1_243 = arith.constant 1 : index
    %c0_244 = arith.constant 0 : index
    %c0_245 = arith.constant 0 : index
    %412 = vector.load %arg13[%c1_243, %c0_244, %c0_245] : memref<2x32x64xbf16, #tpu.memory_space<vmem>>, vector<1x32x64xbf16>
    %413 = vector.shape_cast %412 : vector<1x32x64xbf16> to vector<32x64xbf16>
    %cst_246 = arith.constant dense<0.000000e+00> : vector<16x64xf32>
    %414 = tpu.matmul %411, %413, %cst_246 {dimension_numbers = #tpu.dot_dimension_numbers<[1], [0], [0], [1], [0, 0, 1, 1], [], []>} : vector<16x32xbf16>, vector<32x64xbf16>, vector<16x64xf32> -> vector<16x64xf32>
    %c1_247 = arith.constant 1 : index
    %c0_248 = arith.constant 0 : index
    %c0_249 = arith.constant 0 : index
    %415 = vector.load %arg14[%c1_247, %c0_248, %c0_249] : memref<2x1x64xf32, #tpu.memory_space<vmem>>, vector<1x1x64xf32>
    %416 = vector.shape_cast %415 : vector<1x1x64xf32> to vector<1x64xf32>
    %417 = vector.broadcast %416 : vector<1x64xf32> to vector<16x64xf32>
    %418 = arith.addf %414, %417 : vector<16x64xf32>
    %419 = arith.mulf %418, %418 : vector<16x64xf32>
    %420 = arith.mulf %418, %419 : vector<16x64xf32>
    %cst_250 = arith.constant 4.471500e-02 : f32
    %421 = vector.broadcast %cst_250 : f32 to vector<16x64xf32>
    %422 = arith.mulf %421, %420 : vector<16x64xf32>
    %423 = arith.addf %418, %422 : vector<16x64xf32>
    %cst_251 = arith.constant 0.797884583 : f32
    %424 = vector.broadcast %cst_251 : f32 to vector<16x64xf32>
    %425 = arith.mulf %424, %423 : vector<16x64xf32>
    %426 = math.tanh %425 : vector<16x64xf32>
    %cst_252 = arith.constant 1.000000e+00 : f32
    %427 = vector.broadcast %cst_252 : f32 to vector<16x64xf32>
    %428 = arith.addf %427, %426 : vector<16x64xf32>
    %cst_253 = arith.constant 5.000000e-01 : f32
    %429 = vector.broadcast %cst_253 : f32 to vector<16x64xf32>
    %430 = arith.mulf %429, %428 : vector<16x64xf32>
    %431 = arith.mulf %418, %430 : vector<16x64xf32>
    %432 = arith.truncf %431 : vector<16x64xf32> to vector<16x64xbf16>
    %c1_254 = arith.constant 1 : index
    %c0_255 = arith.constant 0 : index
    %c0_256 = arith.constant 0 : index
    %433 = vector.load %arg15[%c1_254, %c0_255, %c0_256] : memref<2x64x32xbf16, #tpu.memory_space<vmem>>, vector<1x64x32xbf16>
    %434 = vector.shape_cast %433 : vector<1x64x32xbf16> to vector<64x32xbf16>
    %cst_257 = arith.constant dense<0.000000e+00> : vector<16x32xf32>
    %435 = tpu.matmul %432, %434, %cst_257 {dimension_numbers = #tpu.dot_dimension_numbers<[1], [0], [0], [1], [0, 0, 1, 1], [], []>} : vector<16x64xbf16>, vector<64x32xbf16>, vector<16x32xf32> -> vector<16x32xf32>
    %c1_258 = arith.constant 1 : index
    %c0_259 = arith.constant 0 : index
    %c0_260 = arith.constant 0 : index
    %436 = vector.load %arg16[%c1_258, %c0_259, %c0_260] : memref<2x1x32xf32, #tpu.memory_space<vmem>>, vector<1x1x32xf32>
    %437 = vector.shape_cast %436 : vector<1x1x32xf32> to vector<1x32xf32>
    %438 = vector.broadcast %437 : vector<1x32xf32> to vector<16x32xf32>
    %439 = arith.addf %435, %438 : vector<16x32xf32>
    %440 = arith.addf %410, %439 : vector<16x32xf32>
    %c1_261 = arith.constant 1 : index
    %c0_262 = arith.constant 0 : index
    %c0_263 = arith.constant 0 : index
    %441 = vector.load %arg19[%c1_261, %c0_262, %c0_263] : memref<2x1x32xf32, #tpu.memory_space<vmem>>, vector<1x1x32xf32>
    %442 = vector.shape_cast %441 : vector<1x1x32xf32> to vector<1x32xf32>
    %c1_264 = arith.constant 1 : index
    %c0_265 = arith.constant 0 : index
    %c0_266 = arith.constant 0 : index
    %443 = vector.load %arg20[%c1_264, %c0_265, %c0_266] : memref<2x1x32xf32, #tpu.memory_space<vmem>>, vector<1x1x32xf32>
    %444 = vector.shape_cast %443 : vector<1x1x32xf32> to vector<1x32xf32>
    %cst_267 = arith.constant dense<0.000000e+00> : vector<16xf32>
    %445 = vector.multi_reduction <add>, %440, %cst_267 [1] : vector<16x32xf32> to vector<16xf32>
    %446 = vector.shape_cast %445 : vector<16xf32> to vector<16x1xf32>
    %cst_268 = arith.constant 3.200000e+01 : f32
    %447 = vector.broadcast %cst_268 : f32 to vector<16x1xf32>
    %448 = arith.divf %446, %447 : vector<16x1xf32>
    %449 = vector.broadcast %448 : vector<16x1xf32> to vector<16x32xf32>
    %450 = arith.subf %440, %449 : vector<16x32xf32>
    %451 = arith.mulf %450, %450 : vector<16x32xf32>
    %cst_269 = arith.constant dense<0.000000e+00> : vector<16xf32>
    %452 = vector.multi_reduction <add>, %451, %cst_269 [1] : vector<16x32xf32> to vector<16xf32>
    %453 = vector.shape_cast %452 : vector<16xf32> to vector<16x1xf32>
    %cst_270 = arith.constant 3.200000e+01 : f32
    %454 = vector.broadcast %cst_270 : f32 to vector<16x1xf32>
    %455 = arith.divf %453, %454 : vector<16x1xf32>
    %456 = vector.broadcast %448 : vector<16x1xf32> to vector<16x32xf32>
    %457 = arith.subf %440, %456 : vector<16x32xf32>
    %cst_271 = arith.constant 9.99999996E-13 : f32
    %458 = vector.broadcast %cst_271 : f32 to vector<16x1xf32>
    %459 = arith.addf %455, %458 : vector<16x1xf32>
    %460 = math.rsqrt %459 : vector<16x1xf32>
    %461 = vector.broadcast %460 : vector<16x1xf32> to vector<16x32xf32>
    %462 = arith.mulf %457, %461 : vector<16x32xf32>
    %463 = vector.broadcast %442 : vector<1x32xf32> to vector<16x32xf32>
    %464 = arith.mulf %462, %463 : vector<16x32xf32>
    %465 = vector.broadcast %444 : vector<1x32xf32> to vector<16x32xf32>
    %466 = arith.addf %464, %465 : vector<16x32xf32>
    %467 = math.tanh %466 : vector<16x32xf32>
    %c0_272 = arith.constant 0 : index
    %c0_273 = arith.constant 0 : index
    %468 = vector.load %arg21[%c0_272, %c0_273] : memref<1x32xf32, #tpu.memory_space<vmem>>, vector<1x32xf32>
    %469 = vector.extract_strided_slice %467 {offsets = [0, 0], sizes = [8, 32], strides = [1, 1]} : vector<16x32xf32> to vector<8x32xf32>
    %cst_274 = arith.constant dense<0.000000e+00> : vector<1x8xf32>
    %470 = tpu.matmul %468, %469, %cst_274 {dimension_numbers = #tpu.dot_dimension_numbers<[1], [1], [0], [0], [0, 0, 1, 0], [], []>} : vector<1x32xf32>, vector<8x32xf32>, vector<1x8xf32> -> vector<1x8xf32>
    %471 = arith.addf %470, %1 : vector<1x8xf32>
    %cst_275 = arith.constant dense<0xFF800000> : vector<1xf32>
    %472 = vector.multi_reduction <maximumf>, %471, %cst_275 [1] : vector<1x8xf32> to vector<1xf32>
    %473 = vector.shape_cast %472 : vector<1xf32> to vector<1x1xf32>
    %474 = vector.broadcast %473 : vector<1x1xf32> to vector<1x8xf32>
    %475 = arith.subf %471, %474 : vector<1x8xf32>
    %476 = math.exp %475 : vector<1x8xf32>
    %cst_276 = arith.constant dense<0.000000e+00> : vector<1xf32>
    %477 = vector.multi_reduction <add>, %476, %cst_276 [1] : vector<1x8xf32> to vector<1xf32>
    %478 = vector.shape_cast %477 : vector<1xf32> to vector<1x1xf32>
    %479 = tpu.reciprocal %478 {approx = true} : vector<1x1xf32> -> vector<1x1xf32>
    %480 = vector.broadcast %479 : vector<1x1xf32> to vector<1x8xf32>
    %481 = arith.mulf %476, %480 : vector<1x8xf32>
    %cst_277 = arith.constant dense<0.000000e+00> : vector<1x32xf32>
    %482 = tpu.matmul %481, %469, %cst_277 {dimension_numbers = #tpu.dot_dimension_numbers<[1], [0], [0], [1], [0, 0, 1, 1], [], []>} : vector<1x8xf32>, vector<8x32xf32>, vector<1x32xf32> -> vector<1x32xf32>
    %483 = vector.extract_strided_slice %467 {offsets = [8, 0], sizes = [8, 32], strides = [1, 1]} : vector<16x32xf32> to vector<8x32xf32>
    %cst_278 = arith.constant dense<0.000000e+00> : vector<1x8xf32>
    %484 = tpu.matmul %468, %483, %cst_278 {dimension_numbers = #tpu.dot_dimension_numbers<[1], [1], [0], [0], [0, 0, 1, 0], [], []>} : vector<1x32xf32>, vector<8x32xf32>, vector<1x8xf32> -> vector<1x8xf32>
    %485 = arith.addf %484, %3 : vector<1x8xf32>
    %cst_279 = arith.constant dense<0xFF800000> : vector<1xf32>
    %486 = vector.multi_reduction <maximumf>, %485, %cst_279 [1] : vector<1x8xf32> to vector<1xf32>
    %487 = vector.shape_cast %486 : vector<1xf32> to vector<1x1xf32>
    %488 = vector.broadcast %487 : vector<1x1xf32> to vector<1x8xf32>
    %489 = arith.subf %485, %488 : vector<1x8xf32>
    %490 = math.exp %489 : vector<1x8xf32>
    %cst_280 = arith.constant dense<0.000000e+00> : vector<1xf32>
    %491 = vector.multi_reduction <add>, %490, %cst_280 [1] : vector<1x8xf32> to vector<1xf32>
    %492 = vector.shape_cast %491 : vector<1xf32> to vector<1x1xf32>
    %493 = tpu.reciprocal %492 {approx = true} : vector<1x1xf32> -> vector<1x1xf32>
    %494 = vector.broadcast %493 : vector<1x1xf32> to vector<1x8xf32>
    %495 = arith.mulf %490, %494 : vector<1x8xf32>
    %cst_281 = arith.constant dense<0.000000e+00> : vector<1x32xf32>
    %496 = tpu.matmul %495, %483, %cst_281 {dimension_numbers = #tpu.dot_dimension_numbers<[1], [0], [0], [1], [0, 0, 1, 1], [], []>} : vector<1x8xf32>, vector<8x32xf32>, vector<1x32xf32> -> vector<1x32xf32>
    %497 = tpu.concatenate %482, %496 in 0 : vector<1x32xf32>, vector<1x32xf32> -> vector<2x32xf32>
    %c0_282 = arith.constant 0 : index
    %c0_283 = arith.constant 0 : index
    %498 = vector.load %arg22[%c0_282, %c0_283] : memref<2x32xf32, #tpu.memory_space<vmem>>, vector<2x32xf32>
    tpu.vector_store %arg22[%c0_282, %c0_283], %497 {strides = array<i32>} : memref<2x32xf32, #tpu.memory_space<vmem>>, vector<2x32xf32>,
    return
  }
  func.func @transform_0(%arg0: i32) -> (i32, i32) {
    %c0_i32 = arith.constant 0 : i32
    %c0_i32_0 = arith.constant 0 : i32
    %c0_i32_1 = arith.constant 0 : i32
    return %c0_i32, %c0_i32_0 : i32, i32
  }
  func.func @transform_1(%arg0: i32) -> (i32, i32, i32) {
    %c0_i32 = arith.constant 0 : i32
    %c0_i32_0 = arith.constant 0 : i32
    %c0_i32_1 = arith.constant 0 : i32
    %c0_i32_2 = arith.constant 0 : i32
    return %c0_i32, %c0_i32_0, %c0_i32_1 : i32, i32, i32
  }
  func.func @transform_2(%arg0: i32) -> (i32, i32) {
    %c0_i32 = arith.constant 0 : i32
    %c0_i32_0 = arith.constant 0 : i32
    %c0_i32_1 = arith.constant 0 : i32
    return %c0_i32, %c0_i32_0 : i32, i32
  }
  func.func @transform_3(%arg0: i32) -> (i32, i32) {
    %c0_i32 = arith.constant 0 : i32
    %c0_i32_0 = arith.constant 0 : i32
    %c0_i32_1 = arith.constant 0 : i32
    return %c0_i32, %c0_i32_0 : i32, i32
  }
  func.func @transform_4(%arg0: i32) -> (i32, i32, i32, i32) {
    %c0_i32 = arith.constant 0 : i32
    %c0_i32_0 = arith.constant 0 : i32
    %c0_i32_1 = arith.constant 0 : i32
    %c0_i32_2 = arith.constant 0 : i32
    %c0_i32_3 = arith.constant 0 : i32
    return %c0_i32, %c0_i32_0, %c0_i32_1, %c0_i32_2 : i32, i32, i32, i32
  }
  func.func @transform_5(%arg0: i32) -> (i32, i32, i32, i32) {
    %c0_i32 = arith.constant 0 : i32
    %c0_i32_0 = arith.constant 0 : i32
    %c0_i32_1 = arith.constant 0 : i32
    %c0_i32_2 = arith.constant 0 : i32
    %c0_i32_3 = arith.constant 0 : i32
    return %c0_i32, %c0_i32_0, %c0_i32_1, %c0_i32_2 : i32, i32, i32, i32
  }
  func.func @transform_6(%arg0: i32) -> (i32, i32, i32, i32) {
    %c0_i32 = arith.constant 0 : i32
    %c0_i32_0 = arith.constant 0 : i32
    %c0_i32_1 = arith.constant 0 : i32
    %c0_i32_2 = arith.constant 0 : i32
    %c0_i32_3 = arith.constant 0 : i32
    return %c0_i32, %c0_i32_0, %c0_i32_1, %c0_i32_2 : i32, i32, i32, i32
  }
  func.func @transform_7(%arg0: i32) -> (i32, i32, i32, i32) {
    %c0_i32 = arith.constant 0 : i32
    %c0_i32_0 = arith.constant 0 : i32
    %c0_i32_1 = arith.constant 0 : i32
    %c0_i32_2 = arith.constant 0 : i32
    %c0_i32_3 = arith.constant 0 : i32
    return %c0_i32, %c0_i32_0, %c0_i32_1, %c0_i32_2 : i32, i32, i32, i32
  }
  func.func @transform_8(%arg0: i32) -> (i32, i32, i32, i32) {
    %c0_i32 = arith.constant 0 : i32
    %c0_i32_0 = arith.constant 0 : i32
    %c0_i32_1 = arith.constant 0 : i32
    %c0_i32_2 = arith.constant 0 : i32
    %c0_i32_3 = arith.constant 0 : i32
    return %c0_i32, %c0_i32_0, %c0_i32_1, %c0_i32_2 : i32, i32, i32, i32
  }
  func.func @transform_9(%arg0: i32) -> (i32, i32, i32, i32) {
    %c0_i32 = arith.constant 0 : i32
    %c0_i32_0 = arith.constant 0 : i32
    %c0_i32_1 = arith.constant 0 : i32
    %c0_i32_2 = arith.constant 0 : i32
    %c0_i32_3 = arith.constant 0 : i32
    return %c0_i32, %c0_i32_0, %c0_i32_1, %c0_i32_2 : i32, i32, i32, i32
  }
  func.func @transform_10(%arg0: i32) -> (i32, i32, i32, i32) {
    %c0_i32 = arith.constant 0 : i32
    %c0_i32_0 = arith.constant 0 : i32
    %c0_i32_1 = arith.constant 0 : i32
    %c0_i32_2 = arith.constant 0 : i32
    %c0_i32_3 = arith.constant 0 : i32
    return %c0_i32, %c0_i32_0, %c0_i32_1, %c0_i32_2 : i32, i32, i32, i32
  }
  func.func @transform_11(%arg0: i32) -> (i32, i32, i32) {
    %c0_i32 = arith.constant 0 : i32
    %c0_i32_0 = arith.constant 0 : i32
    %c0_i32_1 = arith.constant 0 : i32
    %c0_i32_2 = arith.constant 0 : i32
    return %c0_i32, %c0_i32_0, %c0_i32_1 : i32, i32, i32
  }
  func.func @transform_12(%arg0: i32) -> (i32, i32, i32) {
    %c0_i32 = arith.constant 0 : i32
    %c0_i32_0 = arith.constant 0 : i32
    %c0_i32_1 = arith.constant 0 : i32
    %c0_i32_2 = arith.constant 0 : i32
    return %c0_i32, %c0_i32_0, %c0_i32_1 : i32, i32, i32
  }
  func.func @transform_13(%arg0: i32) -> (i32, i32, i32) {
    %c0_i32 = arith.constant 0 : i32
    %c0_i32_0 = arith.constant 0 : i32
    %c0_i32_1 = arith.constant 0 : i32
    %c0_i32_2 = arith.constant 0 : i32
    return %c0_i32, %c0_i32_0, %c0_i32_1 : i32, i32, i32
  }
  func.func @transform_14(%arg0: i32) -> (i32, i32, i32) {
    %c0_i32 = arith.constant 0 : i32
    %c0_i32_0 = arith.constant 0 : i32
    %c0_i32_1 = arith.constant 0 : i32
    %c0_i32_2 = arith.constant 0 : i32
    return %c0_i32, %c0_i32_0, %c0_i32_1 : i32, i32, i32
  }
  func.func @transform_15(%arg0: i32) -> (i32, i32, i32) {
    %c0_i32 = arith.constant 0 : i32
    %c0_i32_0 = arith.constant 0 : i32
    %c0_i32_1 = arith.constant 0 : i32
    %c0_i32_2 = arith.constant 0 : i32
    return %c0_i32, %c0_i32_0, %c0_i32_1 : i32, i32, i32
  }
  func.func @transform_16(%arg0: i32) -> (i32, i32, i32) {
    %c0_i32 = arith.constant 0 : i32
    %c0_i32_0 = arith.constant 0 : i32
    %c0_i32_1 = arith.constant 0 : i32
    %c0_i32_2 = arith.constant 0 : i32
    return %c0_i32, %c0_i32_0, %c0_i32_1 : i32, i32, i32
  }
  func.func @transform_17(%arg0: i32) -> (i32, i32, i32) {
    %c0_i32 = arith.constant 0 : i32
    %c0_i32_0 = arith.constant 0 : i32
    %c0_i32_1 = arith.constant 0 : i32
    %c0_i32_2 = arith.constant 0 : i32
    return %c0_i32, %c0_i32_0, %c0_i32_1 : i32, i32, i32
  }
  func.func @transform_18(%arg0: i32) -> (i32, i32, i32) {
    %c0_i32 = arith.constant 0 : i32
    %c0_i32_0 = arith.constant 0 : i32
    %c0_i32_1 = arith.constant 0 : i32
    %c0_i32_2 = arith.constant 0 : i32
    return %c0_i32, %c0_i32_0, %c0_i32_1 : i32, i32, i32
  }
  func.func @transform_19(%arg0: i32) -> (i32, i32, i32) {
    %c0_i32 = arith.constant 0 : i32
    %c0_i32_0 = arith.constant 0 : i32
    %c0_i32_1 = arith.constant 0 : i32
    %c0_i32_2 = arith.constant 0 : i32
    return %c0_i32, %c0_i32_0, %c0_i32_1 : i32, i32, i32
  }
  func.func @transform_20(%arg0: i32) -> (i32, i32) {
    %c0_i32 = arith.constant 0 : i32
    %c0_i32_0 = arith.constant 0 : i32
    %c0_i32_1 = arith.constant 0 : i32
    return %c0_i32, %c0_i32_0 : i32, i32
  }
  func.func @transform_21(%arg0: i32) -> (i32, i32) {
    %c0_i32 = arith.constant 0 : i32
    %c0_i32_0 = arith.constant 0 : i32
    %c0_i32_1 = arith.constant 0 : i32
    return %c0_i32, %c0_i32_0 : i32, i32
  }
}

</mosaic_0001>

<bundles_post_ra>
// kernel: bert_siamese_forward.1
= control target key start
LH: loop header
LB: loop body
LE: loop exit
PB: predicated region body
PF: predicated region fallthrough
CT: control target
= control target key end

     0   :  { %s4900_s0 = inlined_call_operand.vmem [shape: f32[16,32], index: 0, kind: input, shape index: {}]   ;;  %s4901_s1 = inlined_call_operand.vmem [shape: f32[2,1,8], index: 1, kind: input, shape index: {}]   ;;  %s4902_s2 = inlined_call_operand.vmem [shape: f32[1,32], index: 2, kind: input, shape index: {}]   ;;  %s4903_s3 = inlined_call_operand.vmem [shape: f32[1,32], index: 3, kind: input, shape index: {}]   ;;  %s4904_s4 = inlined_call_operand.vmem [shape: bf16[2,2,32,16], index: 4, kind: input, shape index: {}]   ;;  %s4905_s5 = inlined_call_operand.vmem [shape: f32[2,2,1,16], index: 5, kind: input, shape index: {}]   ;;  %s4906_s6 = inlined_call_operand.vmem [shape: bf16[2,2,32,16], index: 6, kind: input, shape index: {}]   ;;  %s4907_s7 = inlined_call_operand.vmem [shape: f32[2,2,1,16], index: 7, kind: input, shape index: {}]   ;;  %s4908_s8 = inlined_call_operand.vmem [shape: bf16[2,2,32,16], index: 8, kind: input, shape index: {}]   ;;  %s4909_s9 = inlined_call_operand.vmem [shape: f32[2,2,1,16], index: 9, kind: input, shape index: {}]   ;;  %s4910_s10 = inlined_call_operand.vmem [shape: bf16[2,2,16,32], index: 10, kind: input, shape index: {}]   ;;  %s4911_s11 = inlined_call_operand.vmem [shape: f32[2,1,32], index: 11, kind: input, shape index: {}]   ;;  %s4912_s12 = inlined_call_operand.vmem [shape: bf16[2,32,64], index: 12, kind: input, shape index: {}]   ;;  %s4913_s13 = inlined_call_operand.vmem [shape: f32[2,1,64], index: 13, kind: input, shape index: {}]   ;;  %s4914_s14 = inlined_call_operand.vmem [shape: bf16[2,64,32], index: 14, kind: input, shape index: {}]   ;;  %s4915_s15 = inlined_call_operand.vmem [shape: f32[2,1,32], index: 15, kind: input, shape index: {}]   ;;  %s4916_s16 = inlined_call_operand.vmem [shape: f32[2,1,32], index: 16, kind: input, shape index: {}]   ;;  %s4917_s17 = inlined_call_operand.vmem [shape: f32[2,1,32], index: 17, kind: input, shape index: {}]   ;;  %s4918_s18 = inlined_call_operand.vmem [shape: f32[2,1,32], index: 18, kind: input, shape index: {}]   ;;  %s4919_s19 = inlined_call_operand.vmem [shape: f32[2,1,32], index: 19, kind: input, shape index: {}]   ;;  %s4920_s20 = inlined_call_operand.vmem [shape: f32[1,32], index: 20, kind: input, shape index: {}]   ;;  %s4921_s21 = inlined_call_operand.hbm [shape: f32[2,32], index: 21, kind: output, shape index: {}]  }
   0x1   :  { %4926 = sst [smem:[#allocation5_spill]] %s4900_s0 }
   0x2   :  { %4927 = sst [smem:[#allocation6_spill]] %s4901_s1 }
   0x3   :  { %4928 = sst [smem:[#allocation7_spill]] %s4902_s2 }
   0x4   :  { %4929 = sst [smem:[#allocation8_spill]] %s4903_s3 }
   0x5   :  { %4930 = sst [smem:[#allocation9_spill]] %s4904_s4 }
   0x6   :  { %4931 = sst [smem:[#allocation10_spill]] %s4905_s5 }
   0x7   :  { %s4932_s26 = sld [smem:[#allocation5_spill]]  ;;  %vm89_vm0 = vcmask 261120  }
   0xd   :  { %v85_v0 = vld [vmem:[%s4932_s26] sm:$0xff]  ;;  %v86_v1 = vld [vmem:[%s4932_s26 + $0x8] sm:$0xff] }
   0xe   :  { %v90_v2 = vsel %vm89_vm0, %v85_v0, 0.0  ;;  %v93_v3 = vsel %vm89_vm0, %v86_v1, 0.0 }
   0xf   :  { %91 = vadd.xlane.f32.xlu0 %v90_v2 }
  0x13   :  { %94 = vadd.xlane.f32.xlu0 %v93_v3 }
  0x14   :  { %26 = vsyncpa [#allocation3], 0  ;;  %s4933_s0 = sld [smem:[#allocation9_spill]]  ;;  %v4095_v15 = vld [vmem:[%s4906_s6] sm:$0xff]   ;;  %v4234_v16 = vmov 0.0   ;;  %v4097_v18 = vld [vmem:[%s4906_s6 + $0x8] sm:$0xff]  }
  0x15   :  { %3807 = vmatprep.subr.bf16.mxu0 %v4234_v16  ;;  %3815 = vmatprep.subr.bf16.mxu1 %v4234_v16  ;;  %vm4235_vm1 = vmmov 0   ;;  %s4934_s25 = sld [smem:[#allocation7_spill]]  ;;  %s4935_s3 = sld [smem:[#allocation8_spill]]  ;;  %v4098_v35 = vld [vmem:[%s4908_s8] sm:$0xff]   ;;  %v4099_v37 = vld [vmem:[%s4908_s8 + $0x8] sm:$0xff]   ;;  %vm331_vm2 = vcmask 130048  }
  0x16   :  { %3816 = vmatpush3.bf16.msra.mxu1 %v4095_v15  ;;  %3811 = vmatprep.mubr.msk.bf16.mxu0 %vm4235_vm1, %v4234_v16  ;;  %v3513_v38 = vld [vmem:[%s4907_s7] ss:$0 sm:$0xff]  ;;  %s4936_s24 = sld [smem:[#allocation10_spill]]  ;;  %v4102_v61 = vld [vmem:[%s4908_s8 + $0x10] sm:$0xff]   ;;  %v4103_v62 = vld [vmem:[%s4908_s8 + $0x18] sm:$0xff]   ;;  %s4937_s1 = sld [smem:[#allocation6_spill]] }
  0x17   :  { %3817 = vmatprep.subr.bf16.mxu1 %v4234_v16  ;;  %3819 = vmatprep.mubr.msk.bf16.mxu1 %vm4235_vm1, %v4234_v16  ;;  %v3517_v53 = vld [vmem:[%s4909_s9] ss:$0 sm:$0xff]  ;;  %vm410_vm3 = vcmask 64512   ;;  %vm1551_vm4 = vcmask 523264   ;;  %vm3243_vm5 = vcmask 57344   ;;  %vm3488_vm6 = vcmask 1040384  }
  0x18   :  { %vm3490_vm7 = vcmask 254976  }
  0x1a   :  { %v4094_v14 = vld [vmem:[%s4933_s0] sm:$0xff]   ;;  %v4096_v17 = vld [vmem:[%s4933_s0 + $0x8] sm:$0xff]   ;;  %3818 = vmatpush3.bf16.msra.mxu1 %v4097_v18  ;;  %v4100_v51 = vld [vmem:[%s4933_s0 + $0x10] sm:$0xff]  }
  0x1b   :  { %3808 = vmatpush3.bf16.msra.mxu0 %v4094_v14  ;;  %3831 = vmatprep.subr.mxu1 %v4234_v16  ;;  %v3507_v27 = vld [vmem:[%s4934_s25] ss:$0 sm:$0xff]  ;;  %v4101_v57 = vld [vmem:[%s4933_s0 + $0x18] sm:$0xff]  }
  0x1c   :  { %3809 = vmatprep.subr.bf16.mxu0 %v4234_v16  ;;  %v3508_v31 = vld [vmem:[%s4935_s3] ss:$0 sm:$0xff] }
  0x1d   :  { %v3509_v41 = vld [vmem:[%s4936_s24] ss:$0 sm:$0xff] }
  0x1e   :  { %v4462_v63 = vld [vmem:[%s4937_s1] ss:$0 sm:$0xff] }
  0x1f   :  { %3810 = vmatpush3.bf16.msra.mxu0 %v4096_v17 }
  0x20   :  { %3823 = vmatprep.subr.bf16.mxu0 %v4234_v16 }
  0x9c   :  { %v92_v4 = vpop.xlane.xlu0 %91 }
  0x9d   :  { %v97_v5 = vmul.f32 0.03125, %v92_v4 }
  0x9f   :  { %v99_v6 = vsub.f32 %v85_v0, %v97_v5  ;;  %v4467_v0 = vld [vmem:[%s4937_s1 + $0x1] ss:$0 sm:$0xff] }
  0xa0   :  { %v95_v7 = vpop.xlane.xlu0 %94 }
  0xa1   :  { %v98_v8 = vmul.f32 0.03125, %v95_v7  ;;  %v101_v9 = vmul.f32 %v99_v6, %v99_v6 }
  0xa3   :  { %v100_v10 = vsub.f32 %v86_v1, %v98_v8  ;;  %v103_v11 = vsel %vm89_vm0, %v101_v9, 0.0 }
  0xa4   :  { %104 = vadd.xlane.f32.xlu1 %v103_v11 }
  0xa5   :  { %v102_v12 = vmul.f32 %v100_v10, %v100_v10 }
  0xa7   :  { %v106_v13 = vsel %vm89_vm0, %v102_v12, 0.0 }
  0xa8   :  { %107 = vadd.xlane.f32.xlu1 %v106_v13  ;;  %v3542_v13 = vld [vmem:[%s4936_s24 + $0x1] ss:$0 sm:$0xff] }
 0x131   :  { %v105_v19 = vpop.xlane.xlu1 %104 }
 0x132   :  { %v109_v20 = vmul.f32 0.03125, %v105_v19 }
 0x134   :  { %v111_v21 = vadd.f32 1e-12, %v109_v20  ;;  %v3552_v20 = vld [vmem:[%s4909_s9 + $0x1] ss:$0 sm:$0xff] }
 0x135   :  { %v108_v22 = vpop.xlane.xlu1 %107 }
 0x136   :  { %4134 = vrsqrt.f32 %v111_v21  ;;  %v110_v23 = vmul.f32 0.03125, %v108_v22 }
 0x138   :  { %v112_v24 = vadd.f32 1e-12, %v110_v23 }
 0x13a   :  { %4136 = vrsqrt.f32 %v112_v24 }
 0x140   :  { %v4135_v25 = vpop.eup %4134 }
 0x141   :  { %v115_v26 = vmul.f32 %v4135_v25, %v99_v6 }
 0x143   :  { %v123_v29 = vmul.f32 %v3507_v27, %v115_v26 }
 0x144   :  { %v4137_v28 = vpop.eup %4136 }
 0x145   :  { %v116_v30 = vmul.f32 %v4137_v28, %v100_v10  ;;  %v4385_v33 = vadd.f32 %v3508_v31, %v123_v29 }
 0x147   :  { %v124_v32 = vmul.f32 %v3507_v27, %v116_v30 }
 0x149   :  { %v4387_v34 = vadd.f32 %v3508_v31, %v124_v32 }
 0x14b   :  { %v4394_v36 = vpack.c.bf16 %v4387_v34, %v4385_v33 }
 0x14d   :  { %3812 = vmatmul.mubr.msk.bf16.vlgmr.msra.gmra.mrb[0].mxu0 %vm89_vm0, %v4394_v36  ;;  %3820 = vmatmul.mubr.msk.bf16.vlgmr.msra.gmra.mrb[0].mxu1 %vm89_vm0, %v4394_v36 }
 0x14e   :  { %3824 = vmatpush3.bf16.msra.mxu0 %v4098_v35  ;;  %3827 = vmatprep.mubr.msk.bf16.mxu0 %vm4235_vm1, %v4234_v16 }
 0x14f   :  { %3825 = vmatprep.subr.bf16.mxu0 %v4234_v16  ;;  %3833 = vmatprep.mubr.msk.f32.mxu1 %vm4235_vm1, %v4234_v16 }
 0x152   :  { %3826 = vmatpush3.bf16.msra.mxu0 %v4099_v37 }
 0x153   :  { %3841 = vmatprep.subr.mxu0 %v4234_v16 }
 0x155   :  { %3828 = vmatmul.mubr.msk.bf16.vlgmr.msra.gmra.mrb[4].mxu0 %vm89_vm0, %v4394_v36 }
 0x156   :  { %3843 = vmatprep.mubr.msk.f32.mxu0 %vm4235_vm1, %v4234_v16 }
 0x220   :  { %v204_v39 = vpop.f32.mrb[0].mxu0  ;;  %v264_v40 = vpop.f32.mrb[0].mxu1 }
 0x221   :  { %v265_v42 = vadd.f32 %v3513_v38, %v264_v40  ;;  %v3813_v43 = vpop.f32.mrb[1].mxu0  ;;  %v3821_v44 = vpop.f32.mrb[1].mxu1  ;;  %v205_v50 = vadd.f32 %v3509_v41, %v204_v39 }
 0x222   :  { %v207_v45 = vpop.f32.mrb[2].mxu0  ;;  %v267_v46 = vpop.f32.mrb[2].mxu1  ;;  %v4105_v44 = vld [vmem:[%s4906_s6 + $0x18] sm:$0xff]  }
 0x223   :  { %v268_v47 = vadd.f32 %v3513_v38, %v267_v46  ;;  %v3814_v48 = vpop.f32.mrb[3].mxu0  ;;  %v3822_v49 = vpop.f32.mrb[3].mxu1  ;;  %3832 = vmatpush3.xpose.msk.msra.mxu1 %vm331_vm2, %v265_v42  ;;  %v208_v52 = vadd.f32 %v3509_v41, %v207_v45  ;;  %v4104_v42 = vld [vmem:[%s4906_s6 + $0x10] sm:$0xff]  }
 0x224   :  { %3836 = vmatprep.subr.mxu1 %v4234_v16  ;;  %v3547_v49 = vld [vmem:[%s4907_s7 + $0x1] ss:$0 sm:$0xff] }
 0x225   :  { %3842 = vmatpush3.xpose.msk.msra.mxu0 %vm331_vm2, %v268_v47 }
 0x226   :  { %3834 = vmatmul.mubr.msk.f32.vlgmr.msra.gmra.mrb[4].mxu1 %vm331_vm2, %v205_v50  ;;  %3851 = vmatprep.subr.bf16.mxu0 %v4234_v16 }
 0x227   :  { %3838 = vmatprep.mubr.msk.f32.mxu1 %vm4235_vm1, %v4234_v16 }
 0x228   :  { %v324_v54 = vpop.f32.mrb[4].mxu0  ;;  %3844 = vmatmul.mubr.msk.f32.vlgmr.msra.gmra.mrb[8].mxu0 %vm331_vm2, %v208_v52 }
 0x229   :  { %v325_v55 = vadd.f32 %v3517_v53, %v324_v54  ;;  %v3829_v56 = vpop.f32.mrb[5].mxu0  ;;  %3852 = vmatpush3.bf16.msra.mxu0 %v4100_v51  ;;  %3855 = vmatprep.mubr.msk.bf16.mxu0 %vm4235_vm1, %v4234_v16 }
 0x22a   :  { %v327_v58 = vpop.f32.mrb[6].mxu0  ;;  %3853 = vmatprep.subr.bf16.mxu0 %v4234_v16 }
 0x22b   :  { %v4439_v59 = vadd.f32 %v3517_v53, %v327_v58  ;;  %v3830_v60 = vpop.f32.mrb[7].mxu0  ;;  %3837 = vmatpush3.msra.mxu1 %v325_v55 }
 0x22c   :  { %3846 = vmatprep.subr.mxu1 %v4234_v16 }
 0x22d   :  { %3854 = vmatpush3.bf16.msra.mxu0 %v4101_v57 }
 0x22e   :  { %3867 = vmatprep.subr.bf16.mxu0 %v4234_v16 }
 0x230   :  { %3856 = vmatmul.mubr.msk.bf16.vlgmr.msra.gmra.mrb[12].mxu0 %vm89_vm0, %v4394_v36 }
 0x231   :  { %3868 = vmatpush3.bf16.msra.mxu0 %v4102_v61  ;;  %3871 = vmatprep.mubr.msk.bf16.mxu0 %vm4235_vm1, %v4234_v16 }
 0x232   :  { %3869 = vmatprep.subr.bf16.mxu0 %v4234_v16 }
 0x235   :  { %3870 = vmatpush3.bf16.msra.mxu0 %v4103_v62 }
 0x236   :  { %3885 = vmatprep.subr.bf16.mxu0 %v4234_v16 }
 0x238   :  { %3872 = vmatmul.mubr.msk.bf16.vlgmr.msra.gmra.mrb[16].mxu0 %vm89_vm0, %v4394_v36 }
 0x239   :  { %3887 = vmatprep.mubr.msk.bf16.mxu0 %vm4235_vm1, %v4234_v16 }
 0x2f9   :  { %v404_v1 = vpop.f32.mrb[4].mxu1 }
 0x2fa   :  { %v408_v2 = vmul.f32 0.25, %v404_v1  ;;  %v3835_v3 = vpop.f32.mrb[5].mxu1 }
 0x2fb   :  { %v568_v4 = vpop.f32.mrb[8].mxu0 }
 0x2fc   :  { %v572_v5 = vmul.f32 0.25, %v568_v4  ;;  %v3845_v6 = vpop.f32.mrb[9].mxu0  ;;  %v409_v7 = vadd.f32 %v4462_v63, %v408_v2 }
 0x2fe   :  { %v411_v8 = vsel %vm410_vm3, %v409_v7, -inf  ;;  %v573_v9 = vadd.f32 %v4467_v0, %v572_v5  ;;  %v4107_v5 = vld [vmem:[%s4910_s10 + $0x8] sm:$0xff]  }
 0x2ff   :  { %412 = vmax.xlane.f32.xlu0 %v411_v8  ;;  %3886 = vmatpush3.bf16.msra.mxu0 %v4107_v5  ;;  %v4106_v8 = vld [vmem:[%s4910_s10] sm:$0xff]  }
 0x300   :  { %v574_v10 = vsel %vm410_vm3, %v573_v9, -inf  ;;  %3897 = vmatprep.subr.mxu0 %v4234_v16 }
 0x301   :  { %575 = vmax.xlane.f32.xlu1 %v574_v10 }
 0x303   :  { %v731_v11 = vpop.f32.mrb[12].mxu0 }
 0x304   :  { %v3857_v12 = vpop.f32.mrb[13].mxu0 }
 0x305   :  { %v734_v14 = vpop.f32.mrb[14].mxu0 }
 0x306   :  { %v4476_v15 = vadd.f32 %v3542_v13, %v734_v14  ;;  %v3858_v17 = vpop.f32.mrb[15].mxu0 }
 0x30b   :  { %v853_v18 = vpop.f32.mrb[16].mxu0 }
 0x30c   :  { %v3873_v19 = vpop.f32.mrb[17].mxu0  ;;  %v854_v56 = vadd.f32 %v3552_v20, %v853_v18 }
 0x30d   :  { %v856_v21 = vpop.f32.mrb[18].mxu0 }
 0x30e   :  { %v4481_v22 = vadd.f32 %v3552_v20, %v856_v21  ;;  %v3874_v23 = vpop.f32.mrb[19].mxu0 }
 0x38c   :  { %v413_v24 = vpop.xlane.xlu0 %412 }
 0x38d   :  { %v414_v25 = vsub.f32 %v409_v7, %v413_v24 }
 0x38e   :  { %v576_v26 = vpop.xlane.xlu1 %575 }
 0x38f   :  { %v415_v27 = vmul.f32 1.442695, %v414_v25  ;;  %v577_v28 = vsub.f32 %v573_v9, %v576_v26  ;;  %v3568_v25 = vld [vmem:[%s4911_s11] ss:$0 sm:$0xff] }
 0x391   :  { %4138 = vpow2.f32 %v415_v27  ;;  %v578_v29 = vmul.f32 1.442695, %v577_v28 }
 0x393   :  { %4140 = vpow2.f32 %v578_v29 }
 0x39b   :  { %v4139_v30 = vpop.eup %4138 }
 0x39c   :  { %v417_v31 = vsel %vm410_vm3, %v4139_v30, 0.0 }
 0x39d   :  { %v4141_v32 = vpop.eup %4140  ;;  %418 = vadd.xlane.f32.xlu0 %v417_v31 }
 0x39e   :  { %v580_v35 = vsel %vm410_vm3, %v4141_v32, 0.0 }
 0x39f   :  { %581 = vadd.xlane.f32.xlu1 %v580_v35 }
 0x42a   :  { %v419_v37 = vpop.xlane.xlu0 %418 }
 0x42b   :  { %4142 = vrcp.f32 %v419_v37 }
 0x42c   :  { %v582_v38 = vpop.xlane.xlu1 %581 }
 0x42d   :  { %4144 = vrcp.f32 %v582_v38 }
 0x435   :  { %v4143_v39 = vpop.eup %4142 }
 0x436   :  { %v421_v40 = vmul.f32 %v4143_v39, %v4139_v30 }
 0x437   :  { %v4145_v41 = vpop.eup %4144 }
 0x438   :  { %3839 = vmatmul.mubr.msk.f32.vlgmr.msra.gmra.mrb[6].mxu1 %vm410_vm3, %v421_v40  ;;  %v584_v43 = vmul.f32 %v4145_v41, %v4141_v32 }
 0x439   :  { %3847 = vmatpush3.msra.mxu1 %v4439_v59  ;;  %3848 = vmatprep.mubr.msk.f32.mxu1 %vm4235_vm1, %v4234_v16 }
 0x43a   :  { %3859 = vmatprep.subr.bf16.mxu1 %v4234_v16 }
 0x43c   :  { %3849 = vmatmul.mubr.msk.f32.vlgmr.msra.gmra.mrb[8].mxu1 %vm410_vm3, %v584_v43 }
 0x43d   :  { %3860 = vmatpush3.bf16.msra.mxu1 %v4104_v42  ;;  %3863 = vmatprep.mubr.msk.bf16.mxu1 %vm4235_vm1, %v4234_v16 }
 0x43e   :  { %3861 = vmatprep.subr.bf16.mxu1 %v4234_v16 }
 0x441   :  { %3862 = vmatpush3.bf16.msra.mxu1 %v4105_v44 }
 0x442   :  { %3875 = vmatprep.subr.mxu1 %v4234_v16 }
 0x444   :  { %3864 = vmatmul.mubr.msk.bf16.vlgmr.msra.gmra.mrb[12].mxu1 %vm89_vm0, %v4394_v36  ;;  %v732_v36 = vadd.f32 %v3542_v13, %v731_v11 }
 0x445   :  { %3877 = vmatprep.mubr.msk.f32.mxu1 %vm4235_vm1, %v4234_v16 }
 0x50b   :  { %v491_v45 = vpop.f32.mrb[6].mxu1 }
 0x50c   :  { %v3840_v46 = vpop.f32.mrb[7].mxu1  ;;  %v495_v10 = vpack.c.bf16 %v491_v45, %v491_v45 }
 0x50f   :  { %v4505_v47 = vpop.f32.mrb[8].mxu1 }
 0x510   :  { %v3850_v48 = vpop.f32.mrb[9].mxu1 }
 0x517   :  { %v792_v50 = vpop.f32.mrb[12].mxu1 }
 0x518   :  { %v793_v51 = vadd.f32 %v3547_v49, %v792_v50  ;;  %v3865_v52 = vpop.f32.mrb[13].mxu1 }
 0x519   :  { %v795_v53 = vpop.f32.mrb[14].mxu1 }
 0x51a   :  { %v796_v54 = vadd.f32 %v3547_v49, %v795_v53  ;;  %v3866_v55 = vpop.f32.mrb[15].mxu1  ;;  %3876 = vmatpush3.xpose.msk.msra.mxu1 %vm331_vm2, %v793_v51  ;;  %v658_v49 = vpack.c.bf16 %v4505_v47, %v4505_v47 }
 0x51b   :  { %3880 = vmatprep.subr.mxu1 %v4234_v16 }
 0x51d   :  { %3878 = vmatmul.mubr.msk.f32.vlgmr.msra.gmra.mrb[10].mxu1 %vm331_vm2, %v732_v36 }
 0x51e   :  { %3881 = vmatpush3.msra.mxu1 %v854_v56  ;;  %3882 = vmatprep.mubr.msk.f32.mxu1 %vm4235_vm1, %v4234_v16 }
 0x51f   :  { %3891 = vmatprep.subr.bf16.mxu1 %v4234_v16 }
 0x5f0   :  { %v932_v57 = vpop.f32.mrb[10].mxu1 }
 0x5f1   :  { %v936_v58 = vmul.f32 0.25, %v932_v57  ;;  %v3879_v59 = vpop.f32.mrb[11].mxu1 }
 0x5f3   :  { %v937_v60 = vadd.f32 %v4462_v63, %v936_v58 }
 0x5f5   :  { %v938_v61 = vsel %vm410_vm3, %v937_v60, -inf }
 0x5f6   :  { %939 = vmax.xlane.f32.xlu0 %v938_v61 }
 0x683   :  { %v940_v62 = vpop.xlane.xlu0 %939 }
 0x684   :  { %v941_v1 = vsub.f32 %v937_v60, %v940_v62 }
 0x686   :  { %v942_v2 = vmul.f32 1.442695, %v941_v1 }
 0x688   :  { %4146 = vpow2.f32 %v942_v2 }
 0x692   :  { %v4147_v3 = vpop.eup %4146 }
 0x693   :  { %v944_v4 = vsel %vm410_vm3, %v4147_v3, 0.0 }
 0x694   :  { %945 = vadd.xlane.f32.xlu1 %v944_v4 }
 0x721   :  { %v946_v6 = vpop.xlane.xlu1 %945 }
 0x722   :  { %4148 = vrcp.f32 %v946_v6  ;;  %v4108_v6 = vld [vmem:[%s4912_s12] sm:$0xff]  }
 0x72c   :  { %v4149_v7 = vpop.eup %4148 }
 0x72d   :  { %v948_v9 = vmul.f32 %v4149_v7, %v4147_v3  ;;  %v4109_v7 = vld [vmem:[%s4912_s12 + $0x8] sm:$0xff]  }
 0x72f   :  { %3883 = vmatmul.mubr.msk.f32.vlgmr.msra.gmra.mrb[16].mxu1 %vm410_vm3, %v948_v9 }
 0x730   :  { %3892 = vmatpush3.bf16.msra.mxu1 %v4106_v8  ;;  %3893 = vmatprep.mubr.msk.bf16.mxu1 %vm4235_vm1, %v4234_v16 }
 0x731   :  { %3902 = vmatprep.subr.mxu1 %v4234_v16 }
 0x733   :  { %3894 = vmatmul.mubr.msk.bf16.vlgmr.msra.gmra.mrb[20].mxu1 %vm331_vm2, %v495_v10 }
 0x734   :  { %3903 = vmatpush3.msra.mxu1 %v4481_v22  ;;  %3904 = vmatprep.mubr.msk.f32.mxu1 %vm4235_vm1, %v4234_v16 }
 0x735   :  { %3913 = vmatprep.subr.bf16.mxu1 %v4234_v16 }
 0x802   :  { %v1018_v11 = vpop.f32.mrb[16].mxu1 }
 0x803   :  { %v1022_v12 = vpack.c.bf16 %v1018_v11, %v1018_v11  ;;  %v3884_v13 = vpop.f32.mrb[17].mxu1 }
 0x805   :  { %3888 = vmatmul.mubr.msk.bf16.vlgmr.msra.gmra.mrb[20].mxu0 %vm331_vm2, %v1022_v12 }
 0x806   :  { %3898 = vmatpush3.xpose.msk.msra.mxu0 %vm331_vm2, %v796_v54  ;;  %v1115_v14 = vpop.f32.mrb[20].mxu1  ;;  %3899 = vmatprep.mubr.msk.f32.mxu0 %vm4235_vm1, %v4234_v16 }
 0x807   :  { %v3895_v17 = vpop.f32.mrb[21].mxu1  ;;  %3907 = vmatprep.subr.bf16.mxu0 %v4234_v16 }
 0x808   :  { %v1118_v18 = vpop.f32.mrb[22].mxu1  ;;  %v3569_v17 = vld [vmem:[%s4916_s16] ss:$0 sm:$0xff] }
 0x809   :  { %v3896_v19 = vpop.f32.mrb[23].mxu1 }
 0x80d   :  { %3900 = vmatmul.mubr.msk.f32.vlgmr.msra.gmra.mrb[10].mxu0 %vm331_vm2, %v4476_v15 }
 0x80e   :  { %3908 = vmatpush3.bf16.msra.mxu0 %v4107_v5  ;;  %3909 = vmatprep.mubr.msk.bf16.mxu0 %vm4235_vm1, %v4234_v16 }
 0x80f   :  { %3919 = vmatprep.subr.bf16.mxu0 %v4234_v16 }
 0x8d8   :  { %v1066_v20 = vpop.f32.mrb[20].mxu0 }
 0x8d9   :  { %v1116_v21 = vadd.f32 %v1115_v14, %v1066_v20  ;;  %v3889_v22 = vpop.f32.mrb[21].mxu0 }
 0x8da   :  { %v1069_v23 = vpop.f32.mrb[22].mxu0 }
 0x8db   :  { %v3890_v24 = vpop.f32.mrb[23].mxu0  ;;  %v1377_v27 = vadd.f32 %v3568_v25, %v1116_v21  ;;  %v3570_v21 = vld [vmem:[%s4917_s17] ss:$0 sm:$0xff] }
 0x8dd   :  { %v1379_v31 = vadd.f32 %v1377_v27, %v4385_v33  ;;  %v4111_v27 = vld [vmem:[%s4914_s14 + $0x8] sm:$0xff]  }
 0x8df   :  { %v1383_v32 = vsel %vm89_vm0, %v1379_v31, 0.0 }
 0x8e0   :  { %v1193_v26 = vpop.f32.mrb[10].mxu0 }
 0x8e1   :  { %v1197_v28 = vmul.f32 0.25, %v1193_v26  ;;  %v3901_v29 = vpop.f32.mrb[11].mxu0  ;;  %v4110_v26 = vld [vmem:[%s4914_s14] sm:$0xff]  }
 0x8e2   :  { %v4113_v29 = vld [vmem:[%s4914_s14 + $0x18] sm:$0xff]  }
 0x8e3   :  { %v1198_v15 = vadd.f32 %v4467_v0, %v1197_v28  ;;  %v4112_v28 = vld [vmem:[%s4914_s14 + $0x10] sm:$0xff]  }
 0x8e5   :  { %v1199_v30 = vsel %vm410_vm3, %v1198_v15, -inf }
 0x8e6   :  { %1200 = vmax.xlane.f32.xlu0 %v1199_v30 }
 0x8ea   :  { %1384 = vadd.xlane.f32.xlu0 %v1383_v32 }
 0x973   :  { %v1201_v35 = vpop.xlane.xlu0 %1200 }
 0x974   :  { %v1202_v37 = vsub.f32 %v1198_v15, %v1201_v35  ;;  %v3571_v15 = vld [vmem:[%s4913_s13] ss:$0 sm:$0xff] }
 0x976   :  { %v1203_v38 = vmul.f32 1.442695, %v1202_v37 }
 0x977   :  { %v1385_v39 = vpop.xlane.xlu0 %1384 }
 0x978   :  { %4150 = vpow2.f32 %v1203_v38  ;;  %v1389_v40 = vmul.f32 0.03125, %v1385_v39 }
 0x97a   :  { %v1391_v41 = vsub.f32 %v1379_v31, %v1389_v40 }
 0x97c   :  { %v1393_v42 = vmul.f32 %v1391_v41, %v1391_v41 }
 0x97e   :  { %v1395_v43 = vsel %vm89_vm0, %v1393_v42, 0.0 }
 0x97f   :  { %1396 = vadd.xlane.f32.xlu0 %v1395_v43 }
 0x982   :  { %v4151_v44 = vpop.eup %4150 }
 0x983   :  { %v1205_v45 = vsel %vm410_vm3, %v4151_v44, 0.0 }
 0x984   :  { %1206 = vadd.xlane.f32.xlu1 %v1205_v45 }
 0xa11   :  { %v1207_v33 = vpop.xlane.xlu1 %1206 }
 0xa12   :  { %4152 = vrcp.f32 %v1207_v33 }
 0xa1c   :  { %v4153_v46 = vpop.eup %4152 }
 0xa1d   :  { %v1209_v48 = vmul.f32 %v4153_v46, %v4151_v44 }
 0xa1f   :  { %3905 = vmatmul.mubr.msk.f32.vlgmr.msra.gmra.mrb[18].mxu1 %vm410_vm3, %v1209_v48 }
 0xa20   :  { %3914 = vmatpush3.bf16.msra.mxu1 %v4106_v8  ;;  %3915 = vmatprep.mubr.msk.bf16.mxu1 %vm4235_vm1, %v4234_v16 }
 0xa21   :  { %3927 = vmatprep.subr.bf16.mxu1 %v4234_v16 }
 0xa23   :  { %3916 = vmatmul.mubr.msk.bf16.vlgmr.msra.gmra.mrb[24].mxu1 %vm331_vm2, %v658_v49 }
 0xa24   :  { %3935 = vmatprep.mubr.msk.bf16.mxu1 %vm4235_vm1, %v4234_v16  ;;  %3928 = vmatpush3.bf16.msra.mxu1 %v4110_v26 }
 0xa25   :  { %3929 = vmatprep.subr.bf16.mxu1 %v4234_v16 }
 0xa28   :  { %3930 = vmatpush3.bf16.msra.mxu1 %v4111_v27  ;;  %v3581_v27 = vld [vmem:[%s4918_s18] ss:$0 sm:$0xff] }
 0xa29   :  { %3931 = vmatprep.subr.bf16.mxu1 %v4234_v16 }
 0xa2c   :  { %3932 = vmatpush3.bf16.msra.mxu1 %v4112_v28 }
 0xa2d   :  { %3933 = vmatprep.subr.bf16.mxu1 %v4234_v16 }
 0xa30   :  { %3934 = vmatpush3.bf16.msra.mxu1 %v4113_v29 }
 0xa31   :  { %3955 = vmatprep.subr.bf16.mxu1 %v4234_v16 }
 0xaf2   :  { %v1279_v50 = vpop.f32.mrb[18].mxu1 }
 0xaf3   :  { %v1283_v51 = vpack.c.bf16 %v1279_v50, %v1279_v50  ;;  %v3906_v52 = vpop.f32.mrb[19].mxu1 }
 0xaf5   :  { %3910 = vmatmul.mubr.msk.bf16.vlgmr.msra.gmra.mrb[24].mxu0 %vm331_vm2, %v1283_v51 }
 0xaf6   :  { %v1364_v53 = vpop.f32.mrb[24].mxu1  ;;  %3923 = vmatprep.mubr.msk.bf16.mxu0 %vm4235_vm1, %v4234_v16  ;;  %3920 = vmatpush3.bf16.msra.mxu0 %v4108_v6 }
 0xaf7   :  { %v3917_v54 = vpop.f32.mrb[25].mxu1  ;;  %3921 = vmatprep.subr.bf16.mxu0 %v4234_v16 }
 0xaf8   :  { %v1367_v55 = vpop.f32.mrb[26].mxu1 }
 0xaf9   :  { %v3918_v36 = vpop.f32.mrb[27].mxu1 }
 0xafa   :  { %3922 = vmatpush3.bf16.msra.mxu0 %v4109_v7 }
 0xafb   :  { %3939 = vmatprep.subr.bf16.mxu0 %v4234_v16 }
 0xbc8   :  { %v1321_v47 = vpop.f32.mrb[24].mxu0 }
 0xbc9   :  { %v1365_v56 = vadd.f32 %v1364_v53, %v1321_v47  ;;  %v3911_v57 = vpop.f32.mrb[25].mxu0 }
 0xbca   :  { %v1324_v58 = vpop.f32.mrb[26].mxu0 }
 0xbcb   :  { %v1378_v59 = vadd.f32 %v3568_v25, %v1365_v56  ;;  %v3912_v60 = vpop.f32.mrb[27].mxu0  ;;  %v3575_v56 = vld [vmem:[%s4915_s15] ss:$0 sm:$0xff] }
 0xbcd   :  { %v1380_v61 = vadd.f32 %v1378_v59, %v4387_v34  ;;  %v1397_v34 = vpop.xlane.xlu0 %1396 }
 0xbce   :  { %v1401_v8 = vmul.f32 0.03125, %v1397_v34 }
 0xbcf   :  { %v1386_v62 = vsel %vm89_vm0, %v1380_v61, 0.0 }
 0xbd0   :  { %1387 = vadd.xlane.f32.xlu1 %v1386_v62  ;;  %v1403_v9 = vadd.f32 1e-12, %v1401_v8 }
 0xbd2   :  { %4154 = vrsqrt.f32 %v1403_v9 }
 0xbdc   :  { %v4155_v13 = vpop.eup %4154 }
 0xbdd   :  { %v1407_v14 = vmul.f32 %v4155_v13, %v1391_v41 }
 0xbdf   :  { %v1415_v19 = vmul.f32 %v3569_v17, %v1407_v14  ;;  %v4114_v14 = vld [vmem:[%s4933_s0 + $0x20] sm:$0xff]  }
 0xbe1   :  { %v1423_v23 = vadd.f32 %v3570_v21, %v1415_v19  ;;  %v4117_v19 = vld [vmem:[%s4908_s8 + $0x28] sm:$0xff]  }
 0xc5d   :  { %v1388_v1 = vpop.xlane.xlu1 %1387 }
 0xc5e   :  { %v1390_v2 = vmul.f32 0.03125, %v1388_v1 }
 0xc60   :  { %v1392_v3 = vsub.f32 %v1380_v61, %v1390_v2 }
 0xc62   :  { %v1394_v4 = vmul.f32 %v1392_v3, %v1392_v3 }
 0xc64   :  { %v1398_v5 = vsel %vm89_vm0, %v1394_v4, 0.0 }
 0xc65   :  { %1399 = vadd.xlane.f32.xlu1 %v1398_v5 }
 0xcf2   :  { %v1400_v10 = vpop.xlane.xlu1 %1399 }
 0xcf3   :  { %v1402_v11 = vmul.f32 0.03125, %v1400_v10 }
 0xcf5   :  { %v1404_v12 = vadd.f32 1e-12, %v1402_v11 }
 0xcf7   :  { %4156 = vrsqrt.f32 %v1404_v12 }
 0xd01   :  { %v4157_v18 = vpop.eup %4156 }
 0xd02   :  { %v1408_v20 = vmul.f32 %v4157_v18, %v1392_v3  ;;  %v4116_v18 = vld [vmem:[%s4933_s0 + $0x28] sm:$0xff]  }
 0xd04   :  { %v1416_v22 = vmul.f32 %v3569_v17, %v1408_v20  ;;  %v4115_v17 = vld [vmem:[%s4908_s8 + $0x20] sm:$0xff]  }
 0xd06   :  { %v1424_v24 = vadd.f32 %v3570_v21, %v1416_v22 }
 0xd08   :  { %v1425_v25 = vpack.c.bf16 %v1424_v24, %v1423_v23 }
 0xd0a   :  { %3924 = vmatmul.mubr.msk.bf16.vlgmr.msra.gmra.mrb[28].mxu0 %vm89_vm0, %v1425_v25 }
 0xd0b   :  { %3943 = vmatprep.mubr.msk.bf16.mxu0 %vm4235_vm1, %v4234_v16  ;;  %3940 = vmatpush3.bf16.msra.mxu0 %v4114_v14 }
 0xd0c   :  { %3941 = vmatprep.subr.bf16.mxu0 %v4234_v16 }
 0xd0f   :  { %3942 = vmatpush3.bf16.msra.mxu0 %v4116_v18 }
 0xd10   :  { %3947 = vmatprep.subr.bf16.mxu0 %v4234_v16 }
 0xddd   :  { %v1486_v30 = vpop.f32.mrb[28].mxu0 }
 0xdde   :  { %v1487_v31 = vadd.f32 %v3571_v15, %v1486_v30  ;;  %v3925_v32 = vpop.f32.mrb[29].mxu0 }
 0xddf   :  { %v1489_v35 = vpop.f32.mrb[30].mxu0 }
 0xde0   :  { %v1493_v37 = vmul.f32 %v1487_v31, %v1487_v31  ;;  %v1490_v38 = vadd.f32 %v3571_v15, %v1489_v35  ;;  %v3926_v39 = vpop.f32.mrb[31].mxu0 }
 0xde2   :  { %v1495_v40 = vmul.f32 %v1493_v37, %v1487_v31  ;;  %v1494_v41 = vmul.f32 %v1490_v38, %v1490_v38 }
 0xde4   :  { %v1497_v42 = vmul.f32 0.044715, %v1495_v40  ;;  %v1496_v43 = vmul.f32 %v1494_v41, %v1490_v38  ;;  %v4119_v40 = vld [vmem:[%s4906_s6 + $0x28] sm:$0xff]   ;;  %v3608_v41 = vld [vmem:[%s4909_s9 + $0x2] ss:$0 sm:$0xff] }
 0xde6   :  { %v1499_v44 = vadd.f32 %v1497_v42, %v1487_v31  ;;  %v1498_v45 = vmul.f32 0.044715, %v1496_v43 }
 0xde8   :  { %v1501_v33 = vmul.f32 0.7978846, %v1499_v44  ;;  %v1500_v46 = vadd.f32 %v1498_v45, %v1490_v38 }
 0xdea   :  { %4158 = vtanh.f32 %v1501_v33  ;;  %v1502_v48 = vmul.f32 0.7978846, %v1500_v46 }
 0xdec   :  { %4160 = vtanh.f32 %v1502_v48 }
 0xdf4   :  { %v4159_v49 = vpop.eup %4158 }
 0xdf5   :  { %v1505_v50 = vadd.f32 1.0, %v4159_v49 }
 0xdf6   :  { %v4161_v51 = vpop.eup %4160 }
 0xdf7   :  { %v1507_v52 = vmul.f32 0.5, %v1505_v50  ;;  %v1506_v53 = vadd.f32 1.0, %v4161_v51 }
 0xdf9   :  { %v1508_v54 = vmul.f32 0.5, %v1506_v53  ;;  %v1509_v55 = vmul.f32 %v1507_v52, %v1487_v31  ;;  %v3582_v31 = vld [vmem:[%s4919_s19] ss:$0 sm:$0xff]  ;;  %v3603_v52 = vld [vmem:[%s4907_s7 + $0x2] ss:$0 sm:$0xff] }
 0xdfb   :  { %v1510_v36 = vmul.f32 %v1508_v54, %v1490_v38  ;;  %v4118_v38 = vld [vmem:[%s4906_s6 + $0x20] sm:$0xff]  }
 0xdfc   :  { %v3598_v54 = vld [vmem:[%s4936_s24 + $0x2] ss:$0 sm:$0xff] }
 0xdfd   :  { %v1511_v47 = vpack.c.bf16 %v1510_v36, %v1509_v55 }
 0xdff   :  { %3936 = vmatmul.mubr.msk.bf16.vlgmr.msra.gmra.mrb[28].mxu1 %vm1551_vm4, %v1511_v47 }
 0xe00   :  { %3959 = vmatprep.mubr.msk.bf16.mxu1 %vm4235_vm1, %v4234_v16  ;;  %3956 = vmatpush3.bf16.msra.mxu1 %v4115_v17 }
 0xe01   :  { %3957 = vmatprep.subr.bf16.mxu1 %v4234_v16 }
 0xe04   :  { %3958 = vmatpush3.bf16.msra.mxu1 %v4117_v19 }
 0xe05   :  { %3968 = vmatprep.subr.mxu1 %v4234_v16 }
 0xed2   :  { %v1589_v57 = vpop.f32.mrb[28].mxu1 }
 0xed3   :  { %v1590_v58 = vadd.f32 %v3575_v56, %v1589_v57  ;;  %v3937_v59 = vpop.f32.mrb[29].mxu1 }
 0xed4   :  { %v1592_v60 = vpop.f32.mrb[30].mxu1  ;;  %v4120_v59 = vld [vmem:[%s4933_s0 + $0x30] sm:$0xff]  }
 0xed5   :  { %v1593_v61 = vadd.f32 %v3575_v56, %v1592_v60  ;;  %v3938_v62 = vpop.f32.mrb[31].mxu1  ;;  %v1596_v1 = vadd.f32 %v1590_v58, %v1423_v23 }
 0xed6   :  { %v4122_v62 = vld [vmem:[%s4908_s8 + $0x30] sm:$0xff]  }
 0xed7   :  { %v1600_v2 = vsel %vm89_vm0, %v1596_v1, 0.0  ;;  %v1597_v3 = vadd.f32 %v1593_v61, %v1424_v24  ;;  %v4121_v61 = vld [vmem:[%s4933_s0 + $0x38] sm:$0xff]  }
 0xed8   :  { %1601 = vadd.xlane.f32.xlu0 %v1600_v2 }
 0xed9   :  { %v1603_v4 = vsel %vm89_vm0, %v1597_v3, 0.0 }
 0xeda   :  { %1604 = vadd.xlane.f32.xlu1 %v1603_v4 }
 0xf65   :  { %v1602_v5 = vpop.xlane.xlu0 %1601 }
 0xf66   :  { %v1606_v6 = vmul.f32 0.03125, %v1602_v5 }
 0xf67   :  { %v1605_v7 = vpop.xlane.xlu1 %1604 }
 0xf68   :  { %v1608_v34 = vsub.f32 %v1596_v1, %v1606_v6  ;;  %v1607_v8 = vmul.f32 0.03125, %v1605_v7  ;;  %v4123_v1 = vld [vmem:[%s4908_s8 + $0x38] sm:$0xff]  }
 0xf6a   :  { %v1609_v9 = vsub.f32 %v1597_v3, %v1607_v8  ;;  %v1610_v10 = vmul.f32 %v1608_v34, %v1608_v34 }
 0xf6c   :  { %v1612_v11 = vsel %vm89_vm0, %v1610_v10, 0.0  ;;  %v1611_v12 = vmul.f32 %v1609_v9, %v1609_v9 }
 0xf6d   :  { %1613 = vadd.xlane.f32.xlu0 %v1612_v11 }
 0xf6e   :  { %v1615_v13 = vsel %vm89_vm0, %v1611_v12, 0.0 }
 0xf6f   :  { %1616 = vadd.xlane.f32.xlu1 %v1615_v13  ;;  %v3633_v13 = vld [vmem:[%s4936_s24 + $0x3] ss:$0 sm:$0xff] }
 0xffa   :  { %v1614_v20 = vpop.xlane.xlu0 %1613 }
 0xffb   :  { %v1618_v21 = vmul.f32 0.03125, %v1614_v20 }
 0xffc   :  { %v1617_v22 = vpop.xlane.xlu1 %1616 }
 0xffd   :  { %v1620_v23 = vadd.f32 1e-12, %v1618_v21  ;;  %v1619_v24 = vmul.f32 0.03125, %v1617_v22  ;;  %v3643_v21 = vld [vmem:[%s4909_s9 + $0x3] ss:$0 sm:$0xff] }
 0xfff   :  { %4162 = vrsqrt.f32 %v1620_v23  ;;  %v1621_v25 = vadd.f32 1e-12, %v1619_v24 }
0x1001   :  { %4164 = vrsqrt.f32 %v1621_v25 }
0x1009   :  { %v4163_v26 = vpop.eup %4162 }
0x100a   :  { %v1624_v28 = vmul.f32 %v4163_v26, %v1608_v34 }
0x100b   :  { %v4165_v29 = vpop.eup %4164 }
0x100c   :  { %v1632_v15 = vmul.f32 %v3581_v27, %v1624_v28  ;;  %v1625_v30 = vmul.f32 %v4165_v29, %v1609_v9 }
0x100e   :  { %v1633_v32 = vmul.f32 %v3581_v27, %v1625_v30  ;;  %v4637_v35 = vadd.f32 %v3582_v31, %v1632_v15 }
0x1010   :  { %v4639_v37 = vadd.f32 %v3582_v31, %v1633_v32 }
0x1012   :  { %v4646_v39 = vpack.c.bf16 %v4639_v37, %v4637_v35 }
0x1014   :  { %3944 = vmatmul.mubr.msk.bf16.vlgmr.msra.gmra.mrb[32].mxu0 %vm89_vm0, %v4646_v39  ;;  %3960 = vmatmul.mubr.msk.bf16.vlgmr.msra.gmra.mrb[32].mxu1 %vm89_vm0, %v4646_v39 }
0x1015   :  { %3948 = vmatpush3.bf16.msra.mxu0 %v4118_v38  ;;  %3951 = vmatprep.mubr.msk.bf16.mxu0 %vm4235_vm1, %v4234_v16 }
0x1016   :  { %3949 = vmatprep.subr.bf16.mxu0 %v4234_v16  ;;  %3970 = vmatprep.mubr.msk.f32.mxu1 %vm4235_vm1, %v4234_v16 }
0x1019   :  { %3950 = vmatpush3.bf16.msra.mxu0 %v4119_v40 }
0x101a   :  { %3963 = vmatprep.subr.mxu0 %v4234_v16 }
0x101c   :  { %3952 = vmatmul.mubr.msk.bf16.vlgmr.msra.gmra.mrb[36].mxu0 %vm89_vm0, %v4646_v39 }
0x101d   :  { %3965 = vmatprep.mubr.msk.f32.mxu0 %vm4235_vm1, %v4234_v16 }
0x10e7   :  { %v1718_v42 = vpop.f32.mrb[32].mxu0  ;;  %v1840_v43 = vpop.f32.mrb[32].mxu1 }
0x10e8   :  { %v1841_v44 = vadd.f32 %v3608_v41, %v1840_v43  ;;  %v3945_v45 = vpop.f32.mrb[33].mxu0  ;;  %v3961_v33 = vpop.f32.mrb[33].mxu1  ;;  %v1719_v57 = vadd.f32 %v3598_v54, %v1718_v42 }
0x10e9   :  { %v1721_v46 = vpop.f32.mrb[34].mxu0  ;;  %v1843_v48 = vpop.f32.mrb[34].mxu1  ;;  %v4124_v45 = vld [vmem:[%s4906_s6 + $0x30] sm:$0xff]  }
0x10ea   :  { %v4668_v49 = vadd.f32 %v3608_v41, %v1843_v48  ;;  %v3946_v50 = vpop.f32.mrb[35].mxu0  ;;  %v3962_v51 = vpop.f32.mrb[35].mxu1  ;;  %3969 = vmatpush3.msra.mxu1 %v1841_v44  ;;  %v1722_v60 = vadd.f32 %v3598_v54, %v1721_v46  ;;  %v4125_v46 = vld [vmem:[%s4906_s6 + $0x38] sm:$0xff]  }
0x10eb   :  { %3978 = vmatprep.subr.mxu1 %v4234_v16 }
0x10ef   :  { %v1779_v53 = vpop.f32.mrb[36].mxu0 }
0x10f0   :  { %v1780_v55 = vadd.f32 %v3603_v52, %v1779_v53  ;;  %v3953_v36 = vpop.f32.mrb[37].mxu0 }
0x10f1   :  { %v1782_v47 = vpop.f32.mrb[38].mxu0 }
0x10f2   :  { %v3954_v56 = vpop.f32.mrb[39].mxu0  ;;  %3964 = vmatpush3.xpose.msk.msra.mxu0 %vm331_vm2, %v1780_v55  ;;  %v1783_v58 = vadd.f32 %v3603_v52, %v1782_v47  ;;  %v3638_v52 = vld [vmem:[%s4907_s7 + $0x3] ss:$0 sm:$0xff] }
0x10f3   :  { %3973 = vmatprep.subr.mxu0 %v4234_v16 }
0x10f5   :  { %3966 = vmatmul.mubr.msk.f32.vlgmr.msra.gmra.mrb[40].mxu0 %vm331_vm2, %v1719_v57 }
0x10f6   :  { %3974 = vmatpush3.xpose.msk.msra.mxu0 %vm331_vm2, %v1783_v58  ;;  %3975 = vmatprep.mubr.msk.f32.mxu0 %vm4235_vm1, %v4234_v16 }
0x10f7   :  { %3983 = vmatprep.subr.bf16.mxu0 %v4234_v16 }
0x10f9   :  { %3976 = vmatmul.mubr.msk.f32.vlgmr.msra.gmra.mrb[42].mxu0 %vm331_vm2, %v1722_v60 }
0x10fa   :  { %3984 = vmatpush3.bf16.msra.mxu0 %v4120_v59  ;;  %3987 = vmatprep.mubr.msk.bf16.mxu0 %vm4235_vm1, %v4234_v16 }
0x10fb   :  { %3985 = vmatprep.subr.bf16.mxu0 %v4234_v16 }
0x10fe   :  { %3986 = vmatpush3.bf16.msra.mxu0 %v4121_v61 }
0x10ff   :  { %3999 = vmatprep.subr.bf16.mxu0 %v4234_v16 }
0x1101   :  { %3988 = vmatmul.mubr.msk.bf16.vlgmr.msra.gmra.mrb[44].mxu0 %vm89_vm0, %v4646_v39 }
0x1102   :  { %4000 = vmatpush3.bf16.msra.mxu0 %v4122_v62  ;;  %4003 = vmatprep.mubr.msk.bf16.mxu0 %vm4235_vm1, %v4234_v16 }
0x1103   :  { %4001 = vmatprep.subr.bf16.mxu0 %v4234_v16 }
0x1106   :  { %4002 = vmatpush3.bf16.msra.mxu0 %v4123_v1 }
0x1107   :  { %4017 = vmatprep.subr.bf16.mxu0 %v4234_v16 }
0x1109   :  { %4004 = vmatmul.mubr.msk.bf16.vlgmr.msra.gmra.mrb[48].mxu0 %vm89_vm0, %v4646_v39 }
0x110a   :  { %4019 = vmatprep.mubr.msk.bf16.mxu0 %vm4235_vm1, %v4234_v16 }
0x11c8   :  { %v1919_v2 = vpop.f32.mrb[40].mxu0 }
0x11c9   :  { %v1923_v3 = vmul.f32 0.25, %v1919_v2  ;;  %v3967_v4 = vpop.f32.mrb[41].mxu0 }
0x11cb   :  { %v1924_v5 = vadd.f32 %v4462_v63, %v1923_v3 }
0x11cc   :  { %v2082_v6 = vpop.f32.mrb[42].mxu0 }
0x11cd   :  { %v2086_v7 = vmul.f32 0.25, %v2082_v6  ;;  %v3977_v34 = vpop.f32.mrb[43].mxu0  ;;  %v1925_v8 = vsel %vm410_vm3, %v1924_v5, -inf  ;;  %v4127_v6 = vld [vmem:[%s4910_s10 + $0x18] sm:$0xff]  }
0x11ce   :  { %1926 = vmax.xlane.f32.xlu0 %v1925_v8  ;;  %4018 = vmatpush3.bf16.msra.mxu0 %v4127_v6  ;;  %v4126_v34 = vld [vmem:[%s4910_s10 + $0x10] sm:$0xff]  }
0x11cf   :  { %v2087_v9 = vadd.f32 %v4467_v0, %v2086_v7  ;;  %4029 = vmatprep.subr.mxu0 %v4234_v16 }
0x11d1   :  { %v2088_v10 = vsel %vm410_vm3, %v2087_v9, -inf }
0x11d2   :  { %2089 = vmax.xlane.f32.xlu1 %v2088_v10 }
0x11d4   :  { %v2245_v11 = vpop.f32.mrb[44].mxu0 }
0x11d5   :  { %v3989_v12 = vpop.f32.mrb[45].mxu0 }
0x11d6   :  { %v2248_v14 = vpop.f32.mrb[46].mxu0 }
0x11d7   :  { %v4718_v17 = vadd.f32 %v3633_v13, %v2248_v14  ;;  %v3990_v18 = vpop.f32.mrb[47].mxu0 }
0x11dc   :  { %v2367_v19 = vpop.f32.mrb[48].mxu0 }
0x11dd   :  { %v4005_v20 = vpop.f32.mrb[49].mxu0  ;;  %v2368_v57 = vadd.f32 %v3643_v21, %v2367_v19 }
0x11de   :  { %v2370_v22 = vpop.f32.mrb[50].mxu0 }
0x11df   :  { %v4723_v23 = vadd.f32 %v3643_v21, %v2370_v22  ;;  %v4006_v24 = vpop.f32.mrb[51].mxu0 }
0x125b   :  { %v1927_v25 = vpop.xlane.xlu0 %1926 }
0x125c   :  { %v1928_v26 = vsub.f32 %v1924_v5, %v1927_v25  ;;  %v3660_v25 = vld [vmem:[%s4911_s11 + $0x1] ss:$0 sm:$0xff] }
0x125e   :  { %v1929_v27 = vmul.f32 1.442695, %v1928_v26 }
0x125f   :  { %v2090_v28 = vpop.xlane.xlu1 %2089 }
0x1260   :  { %4166 = vpow2.f32 %v1929_v27  ;;  %v2091_v29 = vsub.f32 %v2087_v9, %v2090_v28 }
0x1262   :  { %v2092_v15 = vmul.f32 1.442695, %v2091_v29 }
0x1264   :  { %4168 = vpow2.f32 %v2092_v15 }
0x126a   :  { %v4167_v30 = vpop.eup %4166 }
0x126b   :  { %v1931_v31 = vsel %vm410_vm3, %v4167_v30, 0.0 }
0x126c   :  { %1932 = vadd.xlane.f32.xlu0 %v1931_v31 }
0x126e   :  { %v4169_v32 = vpop.eup %4168 }
0x126f   :  { %v2094_v38 = vsel %vm410_vm3, %v4169_v32, 0.0 }
0x1270   :  { %2095 = vadd.xlane.f32.xlu1 %v2094_v38 }
0x12f9   :  { %v1933_v40 = vpop.xlane.xlu0 %1932 }
0x12fa   :  { %4170 = vrcp.f32 %v1933_v40 }
0x12fd   :  { %v2096_v41 = vpop.xlane.xlu1 %2095 }
0x12fe   :  { %4172 = vrcp.f32 %v2096_v41 }
0x1304   :  { %v4171_v42 = vpop.eup %4170 }
0x1305   :  { %v1935_v43 = vmul.f32 %v4171_v42, %v4167_v30 }
0x1307   :  { %3971 = vmatmul.mubr.msk.f32.vlgmr.msra.gmra.mrb[36].mxu1 %vm410_vm3, %v1935_v43 }
0x1308   :  { %v4173_v44 = vpop.eup %4172  ;;  %3979 = vmatpush3.msra.mxu1 %v4668_v49  ;;  %3980 = vmatprep.mubr.msk.f32.mxu1 %vm4235_vm1, %v4234_v16 }
0x1309   :  { %v2098_v33 = vmul.f32 %v4173_v44, %v4169_v32  ;;  %3991 = vmatprep.subr.bf16.mxu1 %v4234_v16 }
0x130b   :  { %3981 = vmatmul.mubr.msk.f32.vlgmr.msra.gmra.mrb[38].mxu1 %vm410_vm3, %v2098_v33 }
0x130c   :  { %3992 = vmatpush3.bf16.msra.mxu1 %v4124_v45  ;;  %3995 = vmatprep.mubr.msk.bf16.mxu1 %vm4235_vm1, %v4234_v16 }
0x130d   :  { %3993 = vmatprep.subr.bf16.mxu1 %v4234_v16 }
0x1310   :  { %3994 = vmatpush3.bf16.msra.mxu1 %v4125_v46 }
0x1311   :  { %4007 = vmatprep.subr.mxu1 %v4234_v16 }
0x1313   :  { %3996 = vmatmul.mubr.msk.bf16.vlgmr.msra.gmra.mrb[40].mxu1 %vm89_vm0, %v4646_v39  ;;  %v2246_v39 = vadd.f32 %v3633_v13, %v2245_v11 }
0x1314   :  { %4009 = vmatprep.mubr.msk.f32.mxu1 %vm4235_vm1, %v4234_v16 }
0x13da   :  { %v2005_v48 = vpop.f32.mrb[36].mxu1 }
0x13db   :  { %v3972_v49 = vpop.f32.mrb[37].mxu1  ;;  %v2009_v9 = vpack.c.bf16 %v2005_v48, %v2005_v48 }
0x13de   :  { %v4747_v50 = vpop.f32.mrb[38].mxu1 }
0x13df   :  { %v3982_v51 = vpop.f32.mrb[39].mxu1  ;;  %v2172_v49 = vpack.c.bf16 %v4747_v50, %v4747_v50 }
0x13e6   :  { %v2306_v53 = vpop.f32.mrb[40].mxu1 }
0x13e7   :  { %v2307_v54 = vadd.f32 %v3638_v52, %v2306_v53  ;;  %v3997_v55 = vpop.f32.mrb[41].mxu1 }
0x13e8   :  { %v2309_v36 = vpop.f32.mrb[42].mxu1 }
0x13e9   :  { %v2310_v47 = vadd.f32 %v3638_v52, %v2309_v36  ;;  %v3998_v56 = vpop.f32.mrb[43].mxu1  ;;  %4008 = vmatpush3.xpose.msk.msra.mxu1 %vm331_vm2, %v2307_v54 }
0x13ea   :  { %4012 = vmatprep.subr.mxu1 %v4234_v16 }
0x13ec   :  { %4010 = vmatmul.mubr.msk.f32.vlgmr.msra.gmra.mrb[44].mxu1 %vm331_vm2, %v2246_v39 }
0x13ed   :  { %4013 = vmatpush3.msra.mxu1 %v2368_v57  ;;  %4014 = vmatprep.mubr.msk.f32.mxu1 %vm4235_vm1, %v4234_v16 }
0x13ee   :  { %4023 = vmatprep.subr.bf16.mxu1 %v4234_v16 }
0x14bf   :  { %v2446_v58 = vpop.f32.mrb[44].mxu1 }
0x14c0   :  { %v2450_v59 = vmul.f32 0.25, %v2446_v58  ;;  %v4011_v60 = vpop.f32.mrb[45].mxu1 }
0x14c2   :  { %v2451_v61 = vadd.f32 %v4462_v63, %v2450_v59 }
0x14c4   :  { %v2452_v62 = vsel %vm410_vm3, %v2451_v61, -inf }
0x14c5   :  { %2453 = vmax.xlane.f32.xlu0 %v2452_v62 }
0x1552   :  { %v2454_v1 = vpop.xlane.xlu0 %2453 }
0x1553   :  { %v2455_v2 = vsub.f32 %v2451_v61, %v2454_v1 }
0x1555   :  { %v2456_v3 = vmul.f32 1.442695, %v2455_v2 }
0x1557   :  { %4174 = vpow2.f32 %v2456_v3 }
0x1561   :  { %v4175_v4 = vpop.eup %4174 }
0x1562   :  { %v2458_v5 = vsel %vm410_vm3, %v4175_v4, 0.0 }
0x1563   :  { %2459 = vadd.xlane.f32.xlu1 %v2458_v5  ;;  %v4128_v5 = vld [vmem:[%s4912_s12 + $0x10] sm:$0xff]  }
0x15f0   :  { %v2460_v7 = vpop.xlane.xlu1 %2459 }
0x15f1   :  { %4176 = vrcp.f32 %v2460_v7 }
0x15fb   :  { %v4177_v63 = vpop.eup %4176 }
0x15fc   :  { %v2462_v8 = vmul.f32 %v4177_v63, %v4175_v4 }
0x15fe   :  { %4015 = vmatmul.mubr.msk.f32.vlgmr.msra.gmra.mrb[46].mxu1 %vm410_vm3, %v2462_v8 }
0x15ff   :  { %4024 = vmatpush3.bf16.msra.mxu1 %v4126_v34  ;;  %4025 = vmatprep.mubr.msk.bf16.mxu1 %vm4235_vm1, %v4234_v16 }
0x1600   :  { %4034 = vmatprep.subr.mxu1 %v4234_v16 }
0x1602   :  { %4026 = vmatmul.mubr.msk.bf16.vlgmr.msra.gmra.mrb[48].mxu1 %vm331_vm2, %v2009_v9 }
0x1603   :  { %4035 = vmatpush3.msra.mxu1 %v4723_v23  ;;  %4036 = vmatprep.mubr.msk.f32.mxu1 %vm4235_vm1, %v4234_v16 }
0x1604   :  { %4045 = vmatprep.subr.bf16.mxu1 %v4234_v16 }
0x16d1   :  { %v2532_v10 = vpop.f32.mrb[46].mxu1 }
0x16d2   :  { %v2536_v11 = vpack.c.bf16 %v2532_v10, %v2532_v10  ;;  %v4016_v12 = vpop.f32.mrb[47].mxu1 }
0x16d3   :  { %v3663_v12 = vld [vmem:[%s4916_s16 + $0x1] ss:$0 sm:$0xff] }
0x16d4   :  { %4020 = vmatmul.mubr.msk.bf16.vlgmr.msra.gmra.mrb[52].mxu0 %vm331_vm2, %v2536_v11 }
0x16d5   :  { %4030 = vmatpush3.xpose.msk.msra.mxu0 %vm331_vm2, %v2310_v47  ;;  %v2629_v13 = vpop.f32.mrb[48].mxu1  ;;  %4031 = vmatprep.mubr.msk.f32.mxu0 %vm4235_vm1, %v4234_v16 }
0x16d6   :  { %v4027_v14 = vpop.f32.mrb[49].mxu1  ;;  %4039 = vmatprep.subr.bf16.mxu0 %v4234_v16 }
0x16d7   :  { %v2632_v18 = vpop.f32.mrb[50].mxu1 }
0x16d8   :  { %v4028_v19 = vpop.f32.mrb[51].mxu1 }
0x16d9   :  { %v3664_v19 = vld [vmem:[%s4917_s17 + $0x1] ss:$0 sm:$0xff] }
0x16dc   :  { %4032 = vmatmul.mubr.msk.f32.vlgmr.msra.gmra.mrb[56].mxu0 %vm331_vm2, %v4718_v17 }
0x16dd   :  { %4040 = vmatpush3.bf16.msra.mxu0 %v4127_v6  ;;  %4041 = vmatprep.mubr.msk.bf16.mxu0 %vm4235_vm1, %v4234_v16  ;;  %v4129_v6 = vld [vmem:[%s4912_s12 + $0x18] sm:$0xff]  }
0x16de   :  { %4051 = vmatprep.subr.bf16.mxu0 %v4234_v16 }
0x17a7   :  { %v2580_v20 = vpop.f32.mrb[52].mxu0 }
0x17a8   :  { %v2630_v21 = vadd.f32 %v2629_v13, %v2580_v20  ;;  %v4021_v22 = vpop.f32.mrb[53].mxu0 }
0x17a9   :  { %v2583_v23 = vpop.f32.mrb[54].mxu0 }
0x17aa   :  { %v4022_v24 = vpop.f32.mrb[55].mxu0  ;;  %v2892_v27 = vadd.f32 %v3660_v25, %v2630_v21 }
0x17ab   :  { %v4130_v24 = vld [vmem:[%s4914_s14 + $0x20] sm:$0xff]  }
0x17ac   :  { %v2894_v30 = vadd.f32 %v2892_v27, %v4637_v35  ;;  %v4133_v27 = vld [vmem:[%s4914_s14 + $0x38] sm:$0xff]  }
0x17ae   :  { %v2900_v31 = vsel %vm89_vm0, %v2894_v30, 0.0 }
0x17af   :  { %v2707_v26 = vpop.f32.mrb[56].mxu0 }
0x17b0   :  { %v2711_v28 = vmul.f32 0.25, %v2707_v26  ;;  %v4033_v29 = vpop.f32.mrb[57].mxu0  ;;  %v4132_v26 = vld [vmem:[%s4914_s14 + $0x30] sm:$0xff]  }
0x17b2   :  { %v2712_v17 = vadd.f32 %v4467_v0, %v2711_v28  ;;  %v3670_v28 = vld [vmem:[%s4913_s13 + $0x1] ss:$0 sm:$0xff] }
0x17b4   :  { %v2713_v15 = vsel %vm410_vm3, %v2712_v17, -inf }
0x17b5   :  { %2714 = vmax.xlane.f32.xlu0 %v2713_v15 }
0x17b9   :  { %2901 = vadd.xlane.f32.xlu0 %v2900_v31 }
0x1842   :  { %v2715_v32 = vpop.xlane.xlu0 %2714 }
0x1843   :  { %v2716_v38 = vsub.f32 %v2712_v17, %v2715_v32 }
0x1845   :  { %v2717_v40 = vmul.f32 1.442695, %v2716_v38 }
0x1846   :  { %v2902_v41 = vpop.xlane.xlu0 %2901 }
0x1847   :  { %4178 = vpow2.f32 %v2717_v40  ;;  %v2906_v42 = vmul.f32 0.03125, %v2902_v41 }
0x1849   :  { %v2908_v43 = vsub.f32 %v2894_v30, %v2906_v42 }
0x184b   :  { %v2910_v44 = vmul.f32 %v2908_v43, %v2908_v43 }
0x184d   :  { %v2912_v45 = vsel %vm89_vm0, %v2910_v44, 0.0 }
0x184e   :  { %2913 = vadd.xlane.f32.xlu0 %v2912_v45 }
0x1851   :  { %v4179_v0 = vpop.eup %4178 }
0x1852   :  { %v2719_v33 = vsel %vm410_vm3, %v4179_v0, 0.0 }
0x1853   :  { %2720 = vadd.xlane.f32.xlu1 %v2719_v33 }
0x18e0   :  { %v2721_v35 = vpop.xlane.xlu1 %2720 }
0x18e1   :  { %4180 = vrcp.f32 %v2721_v35 }
0x18eb   :  { %v4181_v46 = vpop.eup %4180 }
0x18ec   :  { %v2723_v48 = vmul.f32 %v4181_v46, %v4179_v0 }
0x18ee   :  { %4037 = vmatmul.mubr.msk.f32.vlgmr.msra.gmra.mrb[52].mxu1 %vm410_vm3, %v2723_v48 }
0x18ef   :  { %4046 = vmatpush3.bf16.msra.mxu1 %v4126_v34  ;;  %4047 = vmatprep.mubr.msk.bf16.mxu1 %vm4235_vm1, %v4234_v16 }
0x18f0   :  { %4059 = vmatprep.subr.bf16.mxu1 %v4234_v16 }
0x18f2   :  { %4048 = vmatmul.mubr.msk.bf16.vlgmr.msra.gmra.mrb[56].mxu1 %vm331_vm2, %v2172_v49 }
0x18f3   :  { %4067 = vmatprep.mubr.msk.bf16.mxu1 %vm4235_vm1, %v4234_v16  ;;  %4060 = vmatpush3.bf16.msra.mxu1 %v4130_v24 }
0x18f4   :  { %4061 = vmatprep.subr.bf16.mxu1 %v4234_v16 }
0x19c1   :  { %v2793_v51 = vpop.f32.mrb[52].mxu1 }
0x19c2   :  { %v2797_v52 = vpack.c.bf16 %v2793_v51, %v2793_v51  ;;  %v4038_v53 = vpop.f32.mrb[53].mxu1 }
0x19c4   :  { %4042 = vmatmul.mubr.msk.bf16.vlgmr.msra.gmra.mrb[60].mxu0 %vm331_vm2, %v2797_v52 }
0x19c5   :  { %v2878_v54 = vpop.f32.mrb[56].mxu1  ;;  %4055 = vmatprep.mubr.msk.bf16.mxu0 %vm4235_vm1, %v4234_v16  ;;  %4052 = vmatpush3.bf16.msra.mxu0 %v4128_v5 }
0x19c6   :  { %v4049_v55 = vpop.f32.mrb[57].mxu1  ;;  %4053 = vmatprep.subr.bf16.mxu0 %v4234_v16 }
0x19c7   :  { %v2881_v36 = vpop.f32.mrb[58].mxu1 }
0x19c8   :  { %v4050_v47 = vpop.f32.mrb[59].mxu1 }
0x19c9   :  { %4054 = vmatpush3.bf16.msra.mxu0 %v4129_v6  ;;  %v3683_v47 = vld [vmem:[%s4915_s15 + $0x1] ss:$0 sm:$0xff] }
0x19ca   :  { %4071 = vmatprep.subr.mxu0 %v4234_v16 }
0x1a97   :  { %v2835_v50 = vpop.f32.mrb[60].mxu0 }
0x1a98   :  { %v2879_v56 = vadd.f32 %v2878_v54, %v2835_v50  ;;  %v4043_v39 = vpop.f32.mrb[61].mxu0 }
0x1a99   :  { %v2838_v57 = vpop.f32.mrb[62].mxu0 }
0x1a9a   :  { %v2893_v58 = vadd.f32 %v3660_v25, %v2879_v56  ;;  %v4044_v59 = vpop.f32.mrb[63].mxu0  ;;  %v4131_v25 = vld [vmem:[%s4914_s14 + $0x28] sm:$0xff]  }
0x1a9b   :  { %4062 = vmatpush3.bf16.msra.mxu1 %v4131_v25 }
0x1a9c   :  { %v2895_v60 = vadd.f32 %v2893_v58, %v4639_v37  ;;  %v2914_v37 = vpop.xlane.xlu0 %2913  ;;  %4063 = vmatprep.subr.bf16.mxu1 %v4234_v16 }
0x1a9d   :  { %v2918_v7 = vmul.f32 0.03125, %v2914_v37 }
0x1a9e   :  { %v2903_v61 = vsel %vm89_vm0, %v2895_v60, 0.0 }
0x1a9f   :  { %2904 = vadd.xlane.f32.xlu1 %v2903_v61  ;;  %v2920_v63 = vadd.f32 1e-12, %v2918_v7  ;;  %4064 = vmatpush3.bf16.msra.mxu1 %v4132_v26 }
0x1aa0   :  { %4065 = vmatprep.subr.bf16.mxu1 %v4234_v16 }
0x1aa1   :  { %4182 = vrsqrt.f32 %v2920_v63 }
0x1aa3   :  { %4066 = vmatpush3.bf16.msra.mxu1 %v4133_v27 }
0x1aa4   :  { %4086 = vmatprep.subr.mxu1 %v4234_v16 }
0x1aab   :  { %v4183_v10 = vpop.eup %4182 }
0x1aac   :  { %v2924_v11 = vmul.f32 %v4183_v10, %v2908_v43 }
0x1aae   :  { %v2932_v14 = vmul.f32 %v3663_v12, %v2924_v11 }
0x1ab0   :  { %v2940_v21 = vadd.f32 %v3664_v19, %v2932_v14 }
0x1b2c   :  { %v2905_v62 = vpop.xlane.xlu1 %2904 }
0x1b2d   :  { %v2907_v1 = vmul.f32 0.03125, %v2905_v62 }
0x1b2f   :  { %v2909_v2 = vsub.f32 %v2895_v60, %v2907_v1 }
0x1b31   :  { %v2911_v3 = vmul.f32 %v2909_v2, %v2909_v2 }
0x1b33   :  { %v2915_v4 = vsel %vm89_vm0, %v2911_v3, 0.0 }
0x1b34   :  { %2916 = vadd.xlane.f32.xlu1 %v2915_v4 }
0x1bc1   :  { %v2917_v34 = vpop.xlane.xlu1 %2916 }
0x1bc2   :  { %v2919_v8 = vmul.f32 0.03125, %v2917_v34 }
0x1bc4   :  { %v2921_v9 = vadd.f32 1e-12, %v2919_v8 }
0x1bc6   :  { %4184 = vrsqrt.f32 %v2921_v9 }
0x1bd0   :  { %v4185_v13 = vpop.eup %4184 }
0x1bd1   :  { %v2925_v18 = vmul.f32 %v4185_v13, %v2909_v2 }
0x1bd3   :  { %v2933_v20 = vmul.f32 %v3663_v12, %v2925_v18 }
0x1bd5   :  { %v2941_v22 = vadd.f32 %v3664_v19, %v2933_v20  ;;  %v3691_v19 = vld [vmem:[%s4918_s18 + $0x1] ss:$0 sm:$0xff] }
0x1bd7   :  { %v2942_v23 = vpack.c.bf16 %v2941_v22, %v2940_v21 }
0x1bd9   :  { %4056 = vmatmul.mubr.msk.bf16.vlgmr.msra.gmra.mrb[64].mxu0 %vm89_vm0, %v2942_v23 }
0x1bda   :  { %4073 = vmatprep.mubr.msk.f32.mxu0 %vm4235_vm1, %v4234_v16 }
0x1cac   :  { %v3005_v29 = vpop.f32.mrb[64].mxu0 }
0x1cad   :  { %v3006_v17 = vadd.f32 %v3670_v28, %v3005_v29  ;;  %v4057_v15 = vpop.f32.mrb[65].mxu0  ;;  %v3166_v29 = vld [vmem:[%s4920_s20] sm:$0x1] }
0x1cae   :  { %v3008_v30 = vpop.f32.mrb[66].mxu0 }
0x1caf   :  { %v3012_v31 = vmul.f32 %v3006_v17, %v3006_v17  ;;  %v3009_v32 = vadd.f32 %v3670_v28, %v3008_v30  ;;  %v4058_v38 = vpop.f32.mrb[67].mxu0  ;;  %v4206_v30 = vld [vmem:[%s4937_s1] sm:$0x1] }
0x1cb1   :  { %v3014_v40 = vmul.f32 %v3012_v31, %v3006_v17  ;;  %v3013_v41 = vmul.f32 %v3009_v32, %v3009_v32 }
0x1cb3   :  { %v3016_v42 = vmul.f32 0.044715, %v3014_v40  ;;  %v3015_v43 = vmul.f32 %v3013_v41, %v3009_v32 }
0x1cb5   :  { %v3018_v44 = vadd.f32 %v3016_v42, %v3006_v17  ;;  %v3017_v45 = vmul.f32 0.044715, %v3015_v43 }
0x1cb7   :  { %v3020_v0 = vmul.f32 0.7978846, %v3018_v44  ;;  %v3019_v33 = vadd.f32 %v3017_v45, %v3009_v32 }
0x1cb9   :  { %4186 = vtanh.f32 %v3020_v0  ;;  %v3021_v35 = vmul.f32 0.7978846, %v3019_v33 }
0x1cbb   :  { %4188 = vtanh.f32 %v3021_v35 }
0x1cc3   :  { %v4187_v46 = vpop.eup %4186 }
0x1cc4   :  { %v3024_v48 = vadd.f32 1.0, %v4187_v46 }
0x1cc5   :  { %v4189_v49 = vpop.eup %4188 }
0x1cc6   :  { %v3026_v51 = vmul.f32 0.5, %v3024_v48  ;;  %v3025_v52 = vadd.f32 1.0, %v4189_v49  ;;  %v4207_v49 = vld [vmem:[%s4937_s1 + $0x1] sm:$0x1]  ;;  %s4236_s1 = smov [#allocation2]  }
0x1cc7   :  { %s3498_s28 = sshll.u32 %s4236_s1, 4  ;;  %s3499_s28 = int_to_ptr.vmem [resolvable:$true] %s3498_s28 }
0x1cc8   :  { %v3027_v53 = vmul.f32 0.5, %v3025_v52  ;;  %v3028_v54 = vmul.f32 %v3026_v51, %v3006_v17  ;;  %s4210_s29 = scalar_lea.vmem %s3499_s28, 32  ;;  %p4215_p1 = scmp.lt.s32.totalorder %s3499_s28, %s3499_s28 }
0x1cc9   :  { %p4211_p0 = scmp.ne.s32.totalorder %s3499_s28, %s4210_s29  ;;  %p4216_p2 = scmp.lt.s32.totalorder %s4210_s29, %s4210_s29 }
0x1cca   :  { %v3029_v55 = vmul.f32 %v3027_v53, %v3009_v32 }
0x1ccb   :  { %p4217_p3 = por %p4216_p2, %p4215_p1 }
0x1ccc   :  { %v3030_v36 = vpack.c.bf16 %v3029_v55, %v3028_v54 }
0x1ccd   :  { %p4218_p4 = pnand %p4217_p3, %p4211_p0 }
0x1cce   :  { %4068 = vmatmul.mubr.msk.bf16.vlgmr.msra.gmra.mrb[60].mxu1 %vm1551_vm4, %v3030_v36 }
0x1ccf   :  { %4088 = vmatprep.mubr.msk.f32.mxu1 %vm4235_vm1, %v4234_v16 }
0x1da1   :  { %v3109_v50 = vpop.f32.mrb[60].mxu1 }
0x1da2   :  { %v3110_v56 = vadd.f32 %v3683_v47, %v3109_v50  ;;  %v4069_v39 = vpop.f32.mrb[61].mxu1 }
0x1da3   :  { %v3112_v57 = vpop.f32.mrb[62].mxu1 }
0x1da4   :  { %v3113_v58 = vadd.f32 %v3683_v47, %v3112_v57  ;;  %v4070_v59 = vpop.f32.mrb[63].mxu1  ;;  %v3116_v60 = vadd.f32 %v3110_v56, %v2940_v21  ;;  %v3692_v21 = vld [vmem:[%s4919_s19 + $0x1] ss:$0 sm:$0xff] }
0x1da6   :  { %v3122_v61 = vsel %vm89_vm0, %v3116_v60, 0.0  ;;  %v3117_v62 = vadd.f32 %v3113_v58, %v2941_v22 }
0x1da7   :  { %3123 = vadd.xlane.f32.xlu0 %v3122_v61 }
0x1da8   :  { %v3125_v1 = vsel %vm89_vm0, %v3117_v62, 0.0 }
0x1dab   :  { %3126 = vadd.xlane.f32.xlu0 %v3125_v1 }
0x1e34   :  { %v3124_v2 = vpop.xlane.xlu0 %3123 }
0x1e35   :  { %v3128_v3 = vmul.f32 0.03125, %v3124_v2 }
0x1e37   :  { %v3130_v4 = vsub.f32 %v3116_v60, %v3128_v3 }
0x1e38   :  { %v3127_v5 = vpop.xlane.xlu0 %3126 }
0x1e39   :  { %v3129_v6 = vmul.f32 0.03125, %v3127_v5  ;;  %v3132_v37 = vmul.f32 %v3130_v4, %v3130_v4 }
0x1e3b   :  { %v3131_v7 = vsub.f32 %v3117_v62, %v3129_v6  ;;  %v3134_v63 = vsel %vm89_vm0, %v3132_v37, 0.0 }
0x1e3c   :  { %3135 = vadd.xlane.f32.xlu1 %v3134_v63 }
0x1e3d   :  { %v3133_v34 = vmul.f32 %v3131_v7, %v3131_v7 }
0x1e3f   :  { %v3137_v8 = vsel %vm89_vm0, %v3133_v34, 0.0 }
0x1e40   :  { %3138 = vadd.xlane.f32.xlu0 %v3137_v8 }
0x1ec9   :  { %v3136_v9 = vpop.xlane.xlu1 %3135 }
0x1eca   :  { %v3140_v10 = vmul.f32 0.03125, %v3136_v9 }
0x1ecc   :  { %v3142_v11 = vadd.f32 1e-12, %v3140_v10 }
0x1ecd   :  { %v3139_v12 = vpop.xlane.xlu0 %3138 }
0x1ece   :  { %4190 = vrsqrt.f32 %v3142_v11  ;;  %v3141_v13 = vmul.f32 0.03125, %v3139_v12 }
0x1ed0   :  { %v3143_v14 = vadd.f32 1e-12, %v3141_v13 }
0x1ed2   :  { %4192 = vrsqrt.f32 %v3143_v14 }
0x1ed8   :  { %v4191_v18 = vpop.eup %4190 }
0x1ed9   :  { %v3146_v20 = vmul.f32 %v4191_v18, %v3130_v4 }
0x1edb   :  { %v3154_v22 = vmul.f32 %v3691_v19, %v3146_v20 }
0x1edc   :  { %v4193_v23 = vpop.eup %4192 }
0x1edd   :  { %v3162_v24 = vadd.f32 %v3692_v21, %v3154_v22  ;;  %v3147_v25 = vmul.f32 %v4193_v23, %v3131_v7 }
0x1edf   :  { %4194 = vtanh.f32 %v3162_v24  ;;  %v3155_v26 = vmul.f32 %v3691_v19, %v3147_v25 }
0x1ee1   :  { %v3163_v27 = vadd.f32 %v3692_v21, %v3155_v26 }
0x1ee3   :  { %4196 = vtanh.f32 %v3163_v27 }
0x1ee9   :  { %v4195_v28 = vpop.eup %4194 }
0x1eea   :  { %4072 = vmatpush3.xpose.msk.msra.mxu0 %vm89_vm0, %v4195_v28 }
0x1eeb   :  { %4076 = vmatprep.subr.mxu0 %v4234_v16 }
0x1eed   :  { %v4197_v17 = vpop.eup %4196  ;;  %4074 = vmatmul.mubr.msk.f32.vlgmr.msra.gmra.mrb[58].mxu0 %vm89_vm0, %v3166_v29 }
0x1eee   :  { %4077 = vmatpush3.msra.mxu0 %v4195_v28  ;;  %4087 = vmatpush3.msra.mxu1 %v4197_v17 }
0x1eef   :  { %4078 = vmatprep.mubr.msk.f32.mxu0 %vm4235_vm1, %v4234_v16  ;;  %4081 = vmatprep.subr.mxu0 %v4234_v16 }
0x1fc0   :  { %v3239_v15 = vpop.f32.mrb[58].mxu0 }
0x1fc1   :  { %v3240_v31 = vadd.f32 %v4206_v30, %v3239_v15  ;;  %v4075_v32 = vpop.f32.mrb[59].mxu0 }
0x1fc3   :  { %v3244_v38 = vsel %vm3243_vm5, %v3240_v31, -inf }
0x1fc4   :  { %3245 = vmax.xlane.f32.xlu1 %v3244_v38 }
0x2051   :  { %v3246_v40 = vpop.xlane.xlu1 %3245 }
0x2052   :  { %v3247_v41 = vsub.f32 %v3240_v31, %v3246_v40 }
0x2054   :  { %v3248_v42 = vmul.f32 1.442695, %v3247_v41 }
0x2056   :  { %4198 = vpow2.f32 %v3248_v42 }
0x2060   :  { %v4199_v43 = vpop.eup %4198 }
0x2061   :  { %v3250_v44 = vsel %vm3243_vm5, %v4199_v43, 0.0 }
0x2062   :  { %3251 = vadd.xlane.f32.xlu1 %v3250_v44 }
0x20ef   :  { %v3252_v45 = vpop.xlane.xlu1 %3251 }
0x20f0   :  { %4200 = vrcp.f32 %v3252_v45 }
0x20fa   :  { %v4201_v0 = vpop.eup %4200 }
0x20fb   :  { %v3254_v33 = vmul.f32 %v4201_v0, %v4199_v43 }
0x20fd   :  { %4079 = vmatmul.mubr.msk.f32.vlgmr.msra.gmra.mrb[68].mxu0 %vm410_vm3, %v3254_v33 }
0x20fe   :  { %4082 = vmatpush3.xpose.msk.msra.mxu0 %vm89_vm0, %v4197_v17  ;;  %4083 = vmatprep.mubr.msk.f32.mxu0 %vm4235_vm1, %v4234_v16 }
0x2101   :  { %4084 = vmatmul.mubr.msk.f32.vlgmr.msra.gmra.mrb[70].mxu0 %vm89_vm0, %v3166_v29 }
0x21d0   :  { %v3324_v35 = vpop.f32.mrb[68].mxu0 }
0x21d1   :  { %v4080_v46 = vpop.f32.mrb[69].mxu0 }
0x21d4   :  { %v3397_v48 = vpop.f32.mrb[70].mxu0 }
0x21d5   :  { %v3398_v51 = vadd.f32 %v4207_v49, %v3397_v48  ;;  %v4085_v52 = vpop.f32.mrb[71].mxu0 }
0x21d7   :  { %v3401_v53 = vsel %vm3243_vm5, %v3398_v51, -inf }
0x21d8   :  { %3402 = vmax.xlane.f32.xlu0 %v3401_v53 }
0x2265   :  { %v3403_v54 = vpop.xlane.xlu0 %3402 }
0x2266   :  { %v3404_v55 = vsub.f32 %v3398_v51, %v3403_v54 }
0x2268   :  { %v3405_v36 = vmul.f32 1.442695, %v3404_v55 }
0x226a   :  { %4202 = vpow2.f32 %v3405_v36 }
0x2274   :  { %v4203_v47 = vpop.eup %4202 }
0x2275   :  { %v3407_v16 = vsel %vm3243_vm5, %v4203_v47, 0.0 }
0x2276   :  { %3408 = vadd.xlane.f32.xlu1 %v3407_v16 }
0x2303   :  { %v3409_v50 = vpop.xlane.xlu1 %3408 }
0x2304   :  { %4204 = vrcp.f32 %v3409_v50 }
0x230e   :  { %v4205_v56 = vpop.eup %4204 }
0x230f   :  { %v3411_v39 = vmul.f32 %v4205_v56, %v4203_v47 }
0x2311   :  { %4089 = vmatmul.mubr.msk.f32.vlgmr.msra.gmra.mrb[54].mxu1 %vm410_vm3, %v3411_v39 }
0x23e4   :  { %v3481_v57 = vpop.f32.mrb[54].mxu1 }
0x23e5   :  { %v3486_v58 = vrot.slane %v3481_v57, 7  ;;  %v4090_v59 = vpop.f32.mrb[55].mxu1 }
0x23e7   :  { %v3489_v60 = vsel %vm3488_vm6, %v3324_v35, %v3486_v58 }
0x23e8   :  { %3491 = vst.msk [vmem:[#allocation2] sm:$0x3] %vm3490_vm7, %v3489_v60 }
0x23e9   :  { %4221 = shalt.err (!%p4218_p4)
}
0x23ea   :  { %s4222_s0 = scalar_lea.hbm %s4921_s21, 32 }
0x23eb   :  { %p4223_p5 = scmp.ne.s32.totalorder %s4921_s21, %s4222_s0  ;;  %p4226_p6 = scmp.lt.u32.totalorder %s4222_s0, %s4921_s21 }
0x23ed   :  { %p4228_p7 = pnand %p4226_p6, %p4223_p5 }
0x23ef   :  { %4231 = shalt.err (!%p4228_p7)
}
0x23f0   :  { %3501 = dma.vmem_to_hbm [thread:$0]  %s3499_s28, 32, %s4921_s21, [#allocation3]  }
0x23f1   :  { %4232 = dma.done.wait [#allocation3], 32  }
0x23f2   :  { %4233 = vsyncadd [#allocation3], 4294967264 }
0x23f3   :  { %3505 = vsyncpa [#allocation3], 1 }

</bundles_post_ra>
